<compile_context>
chip_gen: v7x
topology: tpu7x:2x2x1
jax: 0.10.0
libtpu: 0.0.40
codegen_flags: <defaults>
</compile_context>

<pallas_src>
import jax
import jax.numpy as jnp
from jax.experimental import pallas as pl
from jax.experimental.pallas import tpu as pltpu


# ------------------------------ Pallas kernel ------------------------------ #

def _net_kernel(x_ref, w1a_ref, w1b_ref, b1_ref, w2a_ref, w2b_ref, b2_ref,
                wf1_ref, bf1_ref, wf2_ref, bf2_ref, feat_ref, out_ref):
    f32 = jnp.float32
    tb = x_ref.shape[0]
    m1 = tb * 24
    m2 = tb * 8

    # ---- conv1 (1 -> 10 ch, 5x5 valid) as 5 Toeplitz matmuls per parity ----
    # rows = (batch, ho); columns of the "a"/"b" accumulators = w_pooled*10+co
    # for the even / odd conv output column of each pooling pair.
    for kh in range(5):
        lhs = x_ref[:, kh:kh + 24, :].reshape(m1, 28)
        da = jnp.dot(lhs, w1a_ref[kh], preferred_element_type=f32)
        db = jnp.dot(lhs, w1b_ref[kh], preferred_element_type=f32)
        y1a = da if kh == 0 else y1a + da
        y1b = db if kh == 0 else y1b + db

    # 2x2 max-pool + bias + ReLU: W-pool is an elementwise max of the even/odd
    # accumulators, H-pool is a max over adjacent row pairs.
    y1 = jnp.maximum(y1a, y1b)                        # (tb*24, 120)
    y1 = y1.reshape(tb * 12, 2, 120)
    y1 = jnp.maximum(y1[:, 0, :], y1[:, 1, :])        # (tb*12, 120)
    p1 = jnp.maximum(y1 + b1_ref[...], 0.0)
    p1 = p1.reshape(tb, 12, 120)                      # lanes = w*10 + cin

    # ---- conv2 (10 -> 20 ch, 5x5 valid), same even/odd-column trick ----
    # TODO(synk): nn.Dropout2d / F.dropout are eval-mode identity here
    # (training-mode stochastic dropout would use pltpu.prng_*).
    for kh in range(5):
        lhs = p1[:, kh:kh + 8, :].reshape(m2, 120)
        da = jnp.dot(lhs, w2a_ref[kh], preferred_element_type=f32)
        db = jnp.dot(lhs, w2b_ref[kh], preferred_element_type=f32)
        y2a = da if kh == 0 else y2a + da
        y2b = db if kh == 0 else y2b + db

    y2 = jnp.maximum(y2a, y2b)                        # (tb*8, 80)
    y2 = y2.reshape(tb * 4, 2, 80)
    y2 = jnp.maximum(y2[:, 0, :], y2[:, 1, :])        # (tb*4, 80)
    p2 = jnp.maximum(y2 + b2_ref[...], 0.0)
    p2 = p2.reshape(tb, 4, 80)                        # (b, hp, wp*20 + cout)

    # ---- fc1 (+ReLU): the torch NCHW flatten permutation is folded into the
    # pre-packed wf1 rows; the flatten itself is 4 K=80 matmuls (no lane
    # concat / transpose in the kernel).
    for hp in range(4):
        d = jnp.dot(p2[:, hp, :], wf1_ref[hp], preferred_element_type=f32)
        feat = d if hp == 0 else feat + d
    feat = jnp.maximum(feat + bf1_ref[...], 0.0)

    # ---- fc2: output lanes zero-padded 10 -> 128, lane-dense HBM store ----
    out = jnp.dot(feat, wf2_ref[...], preferred_element_type=f32) + bf2_ref[...]

    feat_ref[...] = feat
    out_ref[...] = out


def _vmem_limit_bytes():
    # v5e/v6e have 128 MiB of VMEM per TensorCore, v7x only 64 MiB.
    try:
        phys = int(pltpu.get_tpu_info().vmem_capacity_bytes)
    except Exception:
        phys = 64 * 1024 * 1024
    return int(min(96 * 1024 * 1024, phys - phys // 4))


def _fused_forward(prep, x, tb):
    b = x.shape[0]
    c2 = lambda i: (0, 0)
    c3 = lambda i: (0, 0, 0)
    feat, out_pad = pl.pallas_call(
        _net_kernel,
        out_shape=(jax.ShapeDtypeStruct((b, 128), jnp.float32),
                   jax.ShapeDtypeStruct((b, 128), jnp.float32)),
        grid_spec=pltpu.PrefetchScalarGridSpec(
            num_scalar_prefetch=0,
            grid=(b // tb,),
            in_specs=[
                pl.BlockSpec((tb, 28, 28), lambda i: (i, 0, 0)),  # x
                pl.BlockSpec((5, 28, 120), c3),    # conv1 slabs, even cols
                pl.BlockSpec((5, 28, 120), c3),    # conv1 slabs, odd cols
                pl.BlockSpec((1, 120), c2),        # conv1 bias (tiled)
                pl.BlockSpec((5, 120, 80), c3),    # conv2 slabs, even cols
                pl.BlockSpec((5, 120, 80), c3),    # conv2 slabs, odd cols
                pl.BlockSpec((1, 80), c2),         # conv2 bias (tiled)
                pl.BlockSpec((4, 80, 128), c3),    # fc1 w (per-hp, permuted)
                pl.BlockSpec((1, 128), c2),        # fc1 b
                pl.BlockSpec((128, 128), c2),      # fc2 w (N padded 10 -> 128)
                pl.BlockSpec((1, 128), c2),        # fc2 b (padded)
            ],
            out_specs=[
                pl.BlockSpec((tb, 128), lambda i: (i, 0)),   # feat
                pl.BlockSpec((tb, 128), lambda i: (i, 0)),   # padded logits
            ],
        ),
        compiler_params=pltpu.CompilerParams(
            dimension_semantics=("parallel",),
            vmem_limit_bytes=_vmem_limit_bytes(),
        ),
    )(x, prep["w1a"], prep["w1b"], prep["b1"],
      prep["w2a"], prep["w2b"], prep["b2"],
      prep["wf1"], prep["bf1"], prep["wf2"], prep["bf2"])
    return feat, out_pad


# ------------------------------ host-side glue ------------------------------ #

def prepare_params(params):
    """One-time repack of PyTorch-layout params into kernel-friendly layouts."""
    f32 = jnp.float32
    w1 = params["conv1_w"].astype(f32)       # (10, 1, 5, 5)
    b1 = params["conv1_b"].astype(f32)       # (10,)
    w2 = params["conv2_w"].astype(f32)       # (20, 10, 5, 5)
    b2 = params["conv2_b"].astype(f32)       # (20,)
    fc1_w = params["fc1_w"].astype(f32)      # (128, 320)
    fc1_b = params["fc1_b"].astype(f32)      # (128,)
    fc2_w = params["fc2_w"].astype(f32)      # (10, 128)
    fc2_b = params["fc2_b"].astype(f32)      # (10,)

    # conv1 banded/Toeplitz slabs, one per kh and output-column parity:
    #   slab[kh, w_in, k*10 + co] = w1[co, 0, kh, w_in - (2k + parity)]
    def conv1_slab(parity):
        w_in = jnp.arange(28)[:, None]
        k = jnp.arange(12)[None, :]
        kw = w_in - (2 * k + parity)
        valid = (kw >= 0) & (kw < 5)
        w1_t = jnp.transpose(w1[:, 0], (1, 2, 0))              # (kh, kw, co)
        s = jnp.where(valid[None, :, :, None],
                      w1_t[:, jnp.clip(kw, 0, 4), :], 0.0)     # (5,28,12,10)
        return s.reshape(5, 28, 120)

    # conv2 slabs over the pooled conv1 lane layout (w*10 + cin):
    #   slab[kh, w*10 + ci, q*20 + co] = w2[co, ci, kh, w - (2q + parity)]
    def conv2_slab(parity):
        w = jnp.arange(12)[:, None]
        q = jnp.arange(4)[None, :]
        kw = w - (2 * q + parity)
        valid = (kw >= 0) & (kw < 5)
        w2_t = jnp.transpose(w2, (2, 3, 1, 0))                 # (kh, kw, ci, co)
        s = jnp.where(valid[None, :, :, None, None],
                      w2_t[:, jnp.clip(kw, 0, 4), :, :], 0.0)  # (5,12,4,10,20)
        return jnp.transpose(s, (0, 1, 3, 2, 4)).reshape(5, 120, 80)

    # biases tiled to the pooled lane layouts
    b1_t = jnp.tile(b1, 12).reshape(1, 120)
    b2_t = jnp.tile(b2, 4).reshape(1, 80)

    # fc1: PyTorch flattens NCHW (c*16 + h*4 + w); the kernel consumes the
    # pooled conv2 tile as 4 per-hp rows of (wp*20 + c) lanes -> permute rows.
    fc1_r = fc1_w.reshape(128, 20, 4, 4)                        # [out, c, h, w]
    wf1 = jnp.transpose(fc1_r, (2, 3, 1, 0)).reshape(4, 80, 128)
    bf1 = fc1_b.reshape(1, 128)

    # fc2: pre-transpose and zero-pad the 10 output columns to 128 lanes.
    wf2 = jnp.pad(fc2_w.T, ((0, 0), (0, 118)))
    bf2 = jnp.pad(fc2_b, (0, 118)).reshape(1, 128)

    return dict(w1a=conv1_slab(0), w1b=conv1_slab(1), b1=b1_t,
                w2a=conv2_slab(0), w2b=conv2_slab(1), b2=b2_t,
                wf1=wf1, bf1=bf1, wf2=wf2, bf2=bf2)


def net_forward(prep, x_nchw):
    """Net.forward (eval mode): x (B,1,28,28) -> (feat (B,128), logits (B,10))."""
    b = x_nchw.shape[0]
    assert x_nchw.shape[1:] == (1, 28, 28)
    # C == 1, so squeezing the channel dim is a pure reshape (no transpose);
    # keeping the input as (B, 28, 28) keeps the VMEM tile lane-dense.
    x = x_nchw.reshape(b, 28, 28).astype(jnp.float32)
    if b <= 128:
        tb, pad = b, 0                      # single grid step
    else:
        # NOTE: on v7x pick tb so that the grid length is a multiple of 2 and
        # both TensorCores get work; 128 keeps the MXU M dimension full.
        tb = 128
        pad = (-b) % tb
    if pad:
        x = jnp.pad(x, ((0, pad), (0, 0), (0, 0)))
    feat, out_pad = _fused_forward(prep, x, tb)
    return feat[:b], out_pad[:b, :10]


def net_forward_ref(params, x_nchw):
    """Pure-XLA reference of the same forward pass (used for the self-check)."""
    hi = jax.lax.Precision.HIGHEST
    dn = ("NCHW", "OIHW", "NCHW")
    y = jax.lax.conv_general_dilated(x_nchw, params["conv1_w"], (1, 1), "VALID",
                                     dimension_numbers=dn, precision=hi)
    y = y + params["conv1_b"][None, :, None, None]
    y = jax.lax.reduce_window(y, -jnp.inf, jax.lax.max,
                              (1, 1, 2, 2), (1, 1, 2, 2), "VALID")
    y = jnp.maximum(y, 0.0)
    y = jax.lax.conv_general_dilated(y, params["conv2_w"], (1, 1), "VALID",
                                     dimension_numbers=dn, precision=hi)
    y = y + params["conv2_b"][None, :, None, None]
    y = jax.lax.reduce_window(y, -jnp.inf, jax.lax.max,
                              (1, 1, 2, 2), (1, 1, 2, 2), "VALID")
    y = jnp.maximum(y, 0.0)
    flat = y.reshape(y.shape[0], -1)           # NCHW flatten == torch .view(-1, 320)
    feat = jnp.maximum(jnp.dot(flat, params["fc1_w"].T, precision=hi)
                       + params["fc1_b"], 0.0)
    out = jnp.dot(feat, params["fc2_w"].T, precision=hi) + params["fc2_b"]
    return feat, out


def init_params(key):
    ks = jax.random.split(key, 8)

    def u(k_, shape, fan_in):
        bound = 1.0 / jnp.sqrt(jnp.float32(fan_in))
        return jax.random.uniform(k_, shape, jnp.float32, -bound, bound)

    return dict(
        conv1_w=u(ks[0], (10, 1, 5, 5), 1 * 5 * 5),
        conv1_b=u(ks[1], (10,), 1 * 5 * 5),
        conv2_w=u(ks[2], (20, 10, 5, 5), 10 * 5 * 5),
        conv2_b=u(ks[3], (20,), 10 * 5 * 5),
        fc1_w=u(ks[4], (128, 320), 320),
        fc1_b=u(ks[5], (128,), 320),
        fc2_w=u(ks[6], (10, 128), 128),
        fc2_b=u(ks[7], (10,), 128),
    )


if __name__ == "__main__":
    key = jax.random.PRNGKey(0)
    pkey, xkey = jax.random.split(key)
    params = init_params(pkey)
    prep = prepare_params(params)              # one-time weight repack
    x = jax.random.normal(xkey, (2, 1, 28, 28), jnp.float32)

    fwd = jax.jit(net_forward)
    feat, out = fwd(prep, x)
    jax.block_until_ready((feat, out))

    assert feat.shape == (2, 128) and out.shape == (2, 10)
    assert bool(jnp.all(jnp.isfinite(feat))) and bool(jnp.all(jnp.isfinite(out)))

    # Cross-check the fused Pallas kernel against a pure-XLA reference.
    feat_ref, out_ref = net_forward_ref(params, x)
    assert jnp.allclose(feat, feat_ref, rtol=5e-2, atol=5e-2), \
        float(jnp.max(jnp.abs(feat - feat_ref)))
    assert jnp.allclose(out, out_ref, rtol=5e-2, atol=5e-2), \
        float(jnp.max(jnp.abs(out - out_ref)))

    print("KERNEL_OK")
</pallas_src>

<mosaic_0001>
module attributes {stable_mosaic.version = 11 : i64} {
  func.func @_net_kernel(%arg0: i32, %arg1: memref<2x28x28xf32, #tpu.memory_space<vmem>>, %arg2: memref<5x28x120xf32, #tpu.memory_space<vmem>>, %arg3: memref<5x28x120xf32, #tpu.memory_space<vmem>>, %arg4: memref<1x120xf32, #tpu.memory_space<vmem>>, %arg5: memref<5x120x80xf32, #tpu.memory_space<vmem>>, %arg6: memref<5x120x80xf32, #tpu.memory_space<vmem>>, %arg7: memref<1x80xf32, #tpu.memory_space<vmem>>, %arg8: memref<4x80x128xf32, #tpu.memory_space<vmem>>, %arg9: memref<1x128xf32, #tpu.memory_space<vmem>>, %arg10: memref<128x128xf32, #tpu.memory_space<vmem>>, %arg11: memref<1x128xf32, #tpu.memory_space<vmem>>, %arg12: memref<2x128xf32, #tpu.memory_space<vmem>>, %arg13: memref<2x128xf32, #tpu.memory_space<vmem>>) attributes {dimension_semantics = [#tpu.dimension_semantics<parallel>], iteration_bounds = array<i64: 1>, scalar_prefetch = 0 : i64, scratch_operands = 0 : i64, tpu.core_type = #tpu.core_type<tc>, window_params = [{transform_indices = @transform_0, window_bounds = array<i64: 2, 28, 28>}, {pipeline_mode = #tpu.pipeline_mode<synchronous>, transform_indices = @transform_1, window_bounds = array<i64: 5, 28, 120>}, {pipeline_mode = #tpu.pipeline_mode<synchronous>, transform_indices = @transform_2, window_bounds = array<i64: 5, 28, 120>}, {pipeline_mode = #tpu.pipeline_mode<synchronous>, transform_indices = @transform_3, window_bounds = array<i64: 1, 120>}, {pipeline_mode = #tpu.pipeline_mode<synchronous>, transform_indices = @transform_4, window_bounds = array<i64: 5, 120, 80>}, {pipeline_mode = #tpu.pipeline_mode<synchronous>, transform_indices = @transform_5, window_bounds = array<i64: 5, 120, 80>}, {pipeline_mode = #tpu.pipeline_mode<synchronous>, transform_indices = @transform_6, window_bounds = array<i64: 1, 80>}, {pipeline_mode = #tpu.pipeline_mode<synchronous>, transform_indices = @transform_7, window_bounds = array<i64: 4, 80, 128>}, {pipeline_mode = #tpu.pipeline_mode<synchronous>, transform_indices = @transform_8, window_bounds = array<i64: 1, 128>}, {pipeline_mode = #tpu.pipeline_mode<synchronous>, transform_indices = @transform_9, window_bounds = array<i64: 128, 128>}, {pipeline_mode = #tpu.pipeline_mode<synchronous>, transform_indices = @transform_10, window_bounds = array<i64: 1, 128>}, {transform_indices = @transform_11, window_bounds = array<i64: 2, 128>}, {transform_indices = @transform_12, window_bounds = array<i64: 2, 128>}]} {
    %c0 = arith.constant 0 : index
    %c0_0 = arith.constant 0 : index
    %c0_1 = arith.constant 0 : index
    %0 = vector.load %arg1[%c0, %c0_0, %c0_1] : memref<2x28x28xf32, #tpu.memory_space<vmem>>, vector<2x24x28xf32>
    %1 = vector.shape_cast %0 : vector<2x24x28xf32> to vector<48x28xf32>
    %c0_2 = arith.constant 0 : index
    %c0_3 = arith.constant 0 : index
    %c0_4 = arith.constant 0 : index
    %2 = vector.load %arg2[%c0_2, %c0_3, %c0_4] : memref<5x28x120xf32, #tpu.memory_space<vmem>>, vector<1x28x120xf32>
    %3 = vector.shape_cast %2 : vector<1x28x120xf32> to vector<28x120xf32>
    %cst = arith.constant dense<0.000000e+00> : vector<48x120xf32>
    %4 = tpu.matmul %1, %3, %cst {dimension_numbers = #tpu.dot_dimension_numbers<[1], [0], [0], [1], [0, 0, 1, 1], [], []>} : vector<48x28xf32>, vector<28x120xf32>, vector<48x120xf32> -> vector<48x120xf32>
    %c0_5 = arith.constant 0 : index
    %c0_6 = arith.constant 0 : index
    %c0_7 = arith.constant 0 : index
    %5 = vector.load %arg3[%c0_5, %c0_6, %c0_7] : memref<5x28x120xf32, #tpu.memory_space<vmem>>, vector<1x28x120xf32>
    %6 = vector.shape_cast %5 : vector<1x28x120xf32> to vector<28x120xf32>
    %cst_8 = arith.constant dense<0.000000e+00> : vector<48x120xf32>
    %7 = tpu.matmul %1, %6, %cst_8 {dimension_numbers = #tpu.dot_dimension_numbers<[1], [0], [0], [1], [0, 0, 1, 1], [], []>} : vector<48x28xf32>, vector<28x120xf32>, vector<48x120xf32> -> vector<48x120xf32>
    %c0_9 = arith.constant 0 : index
    %c1 = arith.constant 1 : index
    %c0_10 = arith.constant 0 : index
    %8 = vector.load %arg1[%c0_9, %c1, %c0_10] : memref<2x28x28xf32, #tpu.memory_space<vmem>>, vector<2x24x28xf32>
    %9 = vector.shape_cast %8 : vector<2x24x28xf32> to vector<48x28xf32>
    %c1_11 = arith.constant 1 : index
    %c0_12 = arith.constant 0 : index
    %c0_13 = arith.constant 0 : index
    %10 = vector.load %arg2[%c1_11, %c0_12, %c0_13] : memref<5x28x120xf32, #tpu.memory_space<vmem>>, vector<1x28x120xf32>
    %11 = vector.shape_cast %10 : vector<1x28x120xf32> to vector<28x120xf32>
    %cst_14 = arith.constant dense<0.000000e+00> : vector<48x120xf32>
    %12 = tpu.matmul %9, %11, %cst_14 {dimension_numbers = #tpu.dot_dimension_numbers<[1], [0], [0], [1], [0, 0, 1, 1], [], []>} : vector<48x28xf32>, vector<28x120xf32>, vector<48x120xf32> -> vector<48x120xf32>
    %c1_15 = arith.constant 1 : index
    %c0_16 = arith.constant 0 : index
    %c0_17 = arith.constant 0 : index
    %13 = vector.load %arg3[%c1_15, %c0_16, %c0_17] : memref<5x28x120xf32, #tpu.memory_space<vmem>>, vector<1x28x120xf32>
    %14 = vector.shape_cast %13 : vector<1x28x120xf32> to vector<28x120xf32>
    %cst_18 = arith.constant dense<0.000000e+00> : vector<48x120xf32>
    %15 = tpu.matmul %9, %14, %cst_18 {dimension_numbers = #tpu.dot_dimension_numbers<[1], [0], [0], [1], [0, 0, 1, 1], [], []>} : vector<48x28xf32>, vector<28x120xf32>, vector<48x120xf32> -> vector<48x120xf32>
    %16 = arith.addf %4, %12 : vector<48x120xf32>
    %17 = arith.addf %7, %15 : vector<48x120xf32>
    %c0_19 = arith.constant 0 : index
    %c2 = arith.constant 2 : index
    %c0_20 = arith.constant 0 : index
    %18 = vector.load %arg1[%c0_19, %c2, %c0_20] : memref<2x28x28xf32, #tpu.memory_space<vmem>>, vector<2x24x28xf32>
    %19 = vector.shape_cast %18 : vector<2x24x28xf32> to vector<48x28xf32>
    %c2_21 = arith.constant 2 : index
    %c0_22 = arith.constant 0 : index
    %c0_23 = arith.constant 0 : index
    %20 = vector.load %arg2[%c2_21, %c0_22, %c0_23] : memref<5x28x120xf32, #tpu.memory_space<vmem>>, vector<1x28x120xf32>
    %21 = vector.shape_cast %20 : vector<1x28x120xf32> to vector<28x120xf32>
    %cst_24 = arith.constant dense<0.000000e+00> : vector<48x120xf32>
    %22 = tpu.matmul %19, %21, %cst_24 {dimension_numbers = #tpu.dot_dimension_numbers<[1], [0], [0], [1], [0, 0, 1, 1], [], []>} : vector<48x28xf32>, vector<28x120xf32>, vector<48x120xf32> -> vector<48x120xf32>
    %c2_25 = arith.constant 2 : index
    %c0_26 = arith.constant 0 : index
    %c0_27 = arith.constant 0 : index
    %23 = vector.load %arg3[%c2_25, %c0_26, %c0_27] : memref<5x28x120xf32, #tpu.memory_space<vmem>>, vector<1x28x120xf32>
    %24 = vector.shape_cast %23 : vector<1x28x120xf32> to vector<28x120xf32>
    %cst_28 = arith.constant dense<0.000000e+00> : vector<48x120xf32>
    %25 = tpu.matmul %19, %24, %cst_28 {dimension_numbers = #tpu.dot_dimension_numbers<[1], [0], [0], [1], [0, 0, 1, 1], [], []>} : vector<48x28xf32>, vector<28x120xf32>, vector<48x120xf32> -> vector<48x120xf32>
    %26 = arith.addf %16, %22 : vector<48x120xf32>
    %27 = arith.addf %17, %25 : vector<48x120xf32>
    %c0_29 = arith.constant 0 : index
    %c3 = arith.constant 3 : index
    %c0_30 = arith.constant 0 : index
    %28 = vector.load %arg1[%c0_29, %c3, %c0_30] : memref<2x28x28xf32, #tpu.memory_space<vmem>>, vector<2x24x28xf32>
    %29 = vector.shape_cast %28 : vector<2x24x28xf32> to vector<48x28xf32>
    %c3_31 = arith.constant 3 : index
    %c0_32 = arith.constant 0 : index
    %c0_33 = arith.constant 0 : index
    %30 = vector.load %arg2[%c3_31, %c0_32, %c0_33] : memref<5x28x120xf32, #tpu.memory_space<vmem>>, vector<1x28x120xf32>
    %31 = vector.shape_cast %30 : vector<1x28x120xf32> to vector<28x120xf32>
    %cst_34 = arith.constant dense<0.000000e+00> : vector<48x120xf32>
    %32 = tpu.matmul %29, %31, %cst_34 {dimension_numbers = #tpu.dot_dimension_numbers<[1], [0], [0], [1], [0, 0, 1, 1], [], []>} : vector<48x28xf32>, vector<28x120xf32>, vector<48x120xf32> -> vector<48x120xf32>
    %c3_35 = arith.constant 3 : index
    %c0_36 = arith.constant 0 : index
    %c0_37 = arith.constant 0 : index
    %33 = vector.load %arg3[%c3_35, %c0_36, %c0_37] : memref<5x28x120xf32, #tpu.memory_space<vmem>>, vector<1x28x120xf32>
    %34 = vector.shape_cast %33 : vector<1x28x120xf32> to vector<28x120xf32>
    %cst_38 = arith.constant dense<0.000000e+00> : vector<48x120xf32>
    %35 = tpu.matmul %29, %34, %cst_38 {dimension_numbers = #tpu.dot_dimension_numbers<[1], [0], [0], [1], [0, 0, 1, 1], [], []>} : vector<48x28xf32>, vector<28x120xf32>, vector<48x120xf32> -> vector<48x120xf32>
    %36 = arith.addf %26, %32 : vector<48x120xf32>
    %37 = arith.addf %27, %35 : vector<48x120xf32>
    %c0_39 = arith.constant 0 : index
    %c4 = arith.constant 4 : index
    %c0_40 = arith.constant 0 : index
    %38 = vector.load %arg1[%c0_39, %c4, %c0_40] : memref<2x28x28xf32, #tpu.memory_space<vmem>>, vector<2x24x28xf32>
    %39 = vector.shape_cast %38 : vector<2x24x28xf32> to vector<48x28xf32>
    %c4_41 = arith.constant 4 : index
    %c0_42 = arith.constant 0 : index
    %c0_43 = arith.constant 0 : index
    %40 = vector.load %arg2[%c4_41, %c0_42, %c0_43] : memref<5x28x120xf32, #tpu.memory_space<vmem>>, vector<1x28x120xf32>
    %41 = vector.shape_cast %40 : vector<1x28x120xf32> to vector<28x120xf32>
    %cst_44 = arith.constant dense<0.000000e+00> : vector<48x120xf32>
    %42 = tpu.matmul %39, %41, %cst_44 {dimension_numbers = #tpu.dot_dimension_numbers<[1], [0], [0], [1], [0, 0, 1, 1], [], []>} : vector<48x28xf32>, vector<28x120xf32>, vector<48x120xf32> -> vector<48x120xf32>
    %c4_45 = arith.constant 4 : index
    %c0_46 = arith.constant 0 : index
    %c0_47 = arith.constant 0 : index
    %43 = vector.load %arg3[%c4_45, %c0_46, %c0_47] : memref<5x28x120xf32, #tpu.memory_space<vmem>>, vector<1x28x120xf32>
    %44 = vector.shape_cast %43 : vector<1x28x120xf32> to vector<28x120xf32>
    %cst_48 = arith.constant dense<0.000000e+00> : vector<48x120xf32>
    %45 = tpu.matmul %39, %44, %cst_48 {dimension_numbers = #tpu.dot_dimension_numbers<[1], [0], [0], [1], [0, 0, 1, 1], [], []>} : vector<48x28xf32>, vector<28x120xf32>, vector<48x120xf32> -> vector<48x120xf32>
    %46 = arith.addf %36, %42 : vector<48x120xf32>
    %47 = arith.addf %37, %45 : vector<48x120xf32>
    %48 = arith.maximumf %46, %47 : vector<48x120xf32>
    %49 = vector.shape_cast %48 : vector<48x120xf32> to vector<24x2x120xf32>
    %50 = vector.extract_strided_slice %49 {offsets = [0, 0, 0], sizes = [24, 1, 120], strides = [1, 1, 1]} : vector<24x2x120xf32> to vector<24x1x120xf32>
    %51 = vector.shape_cast %50 : vector<24x1x120xf32> to vector<24x120xf32>
    %52 = vector.extract_strided_slice %49 {offsets = [0, 1, 0], sizes = [24, 1, 120], strides = [1, 1, 1]} : vector<24x2x120xf32> to vector<24x1x120xf32>
    %53 = vector.shape_cast %52 : vector<24x1x120xf32> to vector<24x120xf32>
    %54 = arith.maximumf %51, %53 : vector<24x120xf32>
    %c0_49 = arith.constant 0 : index
    %c0_50 = arith.constant 0 : index
    %55 = vector.load %arg4[%c0_49, %c0_50] : memref<1x120xf32, #tpu.memory_space<vmem>>, vector<1x120xf32>
    %56 = vector.broadcast %55 : vector<1x120xf32> to vector<24x120xf32>
    %57 = arith.addf %54, %56 : vector<24x120xf32>
    %cst_51 = arith.constant 0.000000e+00 : f32
    %58 = vector.broadcast %cst_51 : f32 to vector<24x120xf32>
    %59 = arith.maximumf %57, %58 : vector<24x120xf32>
    %60 = vector.shape_cast %59 : vector<24x120xf32> to vector<2x12x120xf32>
    %61 = vector.extract_strided_slice %60 {offsets = [0, 0, 0], sizes = [2, 8, 120], strides = [1, 1, 1]} : vector<2x12x120xf32> to vector<2x8x120xf32>
    %62 = vector.shape_cast %61 : vector<2x8x120xf32> to vector<16x120xf32>
    %c0_52 = arith.constant 0 : index
    %c0_53 = arith.constant 0 : index
    %c0_54 = arith.constant 0 : index
    %63 = vector.load %arg5[%c0_52, %c0_53, %c0_54] : memref<5x120x80xf32, #tpu.memory_space<vmem>>, vector<1x120x80xf32>
    %64 = vector.shape_cast %63 : vector<1x120x80xf32> to vector<120x80xf32>
    %cst_55 = arith.constant dense<0.000000e+00> : vector<16x80xf32>
    %65 = tpu.matmul %62, %64, %cst_55 {dimension_numbers = #tpu.dot_dimension_numbers<[1], [0], [0], [1], [0, 0, 1, 1], [], []>} : vector<16x120xf32>, vector<120x80xf32>, vector<16x80xf32> -> vector<16x80xf32>
    %c0_56 = arith.constant 0 : index
    %c0_57 = arith.constant 0 : index
    %c0_58 = arith.constant 0 : index
    %66 = vector.load %arg6[%c0_56, %c0_57, %c0_58] : memref<5x120x80xf32, #tpu.memory_space<vmem>>, vector<1x120x80xf32>
    %67 = vector.shape_cast %66 : vector<1x120x80xf32> to vector<120x80xf32>
    %cst_59 = arith.constant dense<0.000000e+00> : vector<16x80xf32>
    %68 = tpu.matmul %62, %67, %cst_59 {dimension_numbers = #tpu.dot_dimension_numbers<[1], [0], [0], [1], [0, 0, 1, 1], [], []>} : vector<16x120xf32>, vector<120x80xf32>, vector<16x80xf32> -> vector<16x80xf32>
    %69 = vector.extract_strided_slice %60 {offsets = [0, 1, 0], sizes = [2, 8, 120], strides = [1, 1, 1]} : vector<2x12x120xf32> to vector<2x8x120xf32>
    %70 = vector.shape_cast %69 : vector<2x8x120xf32> to vector<16x120xf32>
    %c1_60 = arith.constant 1 : index
    %c0_61 = arith.constant 0 : index
    %c0_62 = arith.constant 0 : index
    %71 = vector.load %arg5[%c1_60, %c0_61, %c0_62] : memref<5x120x80xf32, #tpu.memory_space<vmem>>, vector<1x120x80xf32>
    %72 = vector.shape_cast %71 : vector<1x120x80xf32> to vector<120x80xf32>
    %cst_63 = arith.constant dense<0.000000e+00> : vector<16x80xf32>
    %73 = tpu.matmul %70, %72, %cst_63 {dimension_numbers = #tpu.dot_dimension_numbers<[1], [0], [0], [1], [0, 0, 1, 1], [], []>} : vector<16x120xf32>, vector<120x80xf32>, vector<16x80xf32> -> vector<16x80xf32>
    %c1_64 = arith.constant 1 : index
    %c0_65 = arith.constant 0 : index
    %c0_66 = arith.constant 0 : index
    %74 = vector.load %arg6[%c1_64, %c0_65, %c0_66] : memref<5x120x80xf32, #tpu.memory_space<vmem>>, vector<1x120x80xf32>
    %75 = vector.shape_cast %74 : vector<1x120x80xf32> to vector<120x80xf32>
    %cst_67 = arith.constant dense<0.000000e+00> : vector<16x80xf32>
    %76 = tpu.matmul %70, %75, %cst_67 {dimension_numbers = #tpu.dot_dimension_numbers<[1], [0], [0], [1], [0, 0, 1, 1], [], []>} : vector<16x120xf32>, vector<120x80xf32>, vector<16x80xf32> -> vector<16x80xf32>
    %77 = arith.addf %65, %73 : vector<16x80xf32>
    %78 = arith.addf %68, %76 : vector<16x80xf32>
    %79 = vector.extract_strided_slice %60 {offsets = [0, 2, 0], sizes = [2, 8, 120], strides = [1, 1, 1]} : vector<2x12x120xf32> to vector<2x8x120xf32>
    %80 = vector.shape_cast %79 : vector<2x8x120xf32> to vector<16x120xf32>
    %c2_68 = arith.constant 2 : index
    %c0_69 = arith.constant 0 : index
    %c0_70 = arith.constant 0 : index
    %81 = vector.load %arg5[%c2_68, %c0_69, %c0_70] : memref<5x120x80xf32, #tpu.memory_space<vmem>>, vector<1x120x80xf32>
    %82 = vector.shape_cast %81 : vector<1x120x80xf32> to vector<120x80xf32>
    %cst_71 = arith.constant dense<0.000000e+00> : vector<16x80xf32>
    %83 = tpu.matmul %80, %82, %cst_71 {dimension_numbers = #tpu.dot_dimension_numbers<[1], [0], [0], [1], [0, 0, 1, 1], [], []>} : vector<16x120xf32>, vector<120x80xf32>, vector<16x80xf32> -> vector<16x80xf32>
    %c2_72 = arith.constant 2 : index
    %c0_73 = arith.constant 0 : index
    %c0_74 = arith.constant 0 : index
    %84 = vector.load %arg6[%c2_72, %c0_73, %c0_74] : memref<5x120x80xf32, #tpu.memory_space<vmem>>, vector<1x120x80xf32>
    %85 = vector.shape_cast %84 : vector<1x120x80xf32> to vector<120x80xf32>
    %cst_75 = arith.constant dense<0.000000e+00> : vector<16x80xf32>
    %86 = tpu.matmul %80, %85, %cst_75 {dimension_numbers = #tpu.dot_dimension_numbers<[1], [0], [0], [1], [0, 0, 1, 1], [], []>} : vector<16x120xf32>, vector<120x80xf32>, vector<16x80xf32> -> vector<16x80xf32>
    %87 = arith.addf %77, %83 : vector<16x80xf32>
    %88 = arith.addf %78, %86 : vector<16x80xf32>
    %89 = vector.extract_strided_slice %60 {offsets = [0, 3, 0], sizes = [2, 8, 120], strides = [1, 1, 1]} : vector<2x12x120xf32> to vector<2x8x120xf32>
    %90 = vector.shape_cast %89 : vector<2x8x120xf32> to vector<16x120xf32>
    %c3_76 = arith.constant 3 : index
    %c0_77 = arith.constant 0 : index
    %c0_78 = arith.constant 0 : index
    %91 = vector.load %arg5[%c3_76, %c0_77, %c0_78] : memref<5x120x80xf32, #tpu.memory_space<vmem>>, vector<1x120x80xf32>
    %92 = vector.shape_cast %91 : vector<1x120x80xf32> to vector<120x80xf32>
    %cst_79 = arith.constant dense<0.000000e+00> : vector<16x80xf32>
    %93 = tpu.matmul %90, %92, %cst_79 {dimension_numbers = #tpu.dot_dimension_numbers<[1], [0], [0], [1], [0, 0, 1, 1], [], []>} : vector<16x120xf32>, vector<120x80xf32>, vector<16x80xf32> -> vector<16x80xf32>
    %c3_80 = arith.constant 3 : index
    %c0_81 = arith.constant 0 : index
    %c0_82 = arith.constant 0 : index
    %94 = vector.load %arg6[%c3_80, %c0_81, %c0_82] : memref<5x120x80xf32, #tpu.memory_space<vmem>>, vector<1x120x80xf32>
    %95 = vector.shape_cast %94 : vector<1x120x80xf32> to vector<120x80xf32>
    %cst_83 = arith.constant dense<0.000000e+00> : vector<16x80xf32>
    %96 = tpu.matmul %90, %95, %cst_83 {dimension_numbers = #tpu.dot_dimension_numbers<[1], [0], [0], [1], [0, 0, 1, 1], [], []>} : vector<16x120xf32>, vector<120x80xf32>, vector<16x80xf32> -> vector<16x80xf32>
    %97 = arith.addf %87, %93 : vector<16x80xf32>
    %98 = arith.addf %88, %96 : vector<16x80xf32>
    %99 = vector.extract_strided_slice %60 {offsets = [0, 4, 0], sizes = [2, 8, 120], strides = [1, 1, 1]} : vector<2x12x120xf32> to vector<2x8x120xf32>
    %100 = vector.shape_cast %99 : vector<2x8x120xf32> to vector<16x120xf32>
    %c4_84 = arith.constant 4 : index
    %c0_85 = arith.constant 0 : index
    %c0_86 = arith.constant 0 : index
    %101 = vector.load %arg5[%c4_84, %c0_85, %c0_86] : memref<5x120x80xf32, #tpu.memory_space<vmem>>, vector<1x120x80xf32>
    %102 = vector.shape_cast %101 : vector<1x120x80xf32> to vector<120x80xf32>
    %cst_87 = arith.constant dense<0.000000e+00> : vector<16x80xf32>
    %103 = tpu.matmul %100, %102, %cst_87 {dimension_numbers = #tpu.dot_dimension_numbers<[1], [0], [0], [1], [0, 0, 1, 1], [], []>} : vector<16x120xf32>, vector<120x80xf32>, vector<16x80xf32> -> vector<16x80xf32>
    %c4_88 = arith.constant 4 : index
    %c0_89 = arith.constant 0 : index
    %c0_90 = arith.constant 0 : index
    %104 = vector.load %arg6[%c4_88, %c0_89, %c0_90] : memref<5x120x80xf32, #tpu.memory_space<vmem>>, vector<1x120x80xf32>
    %105 = vector.shape_cast %104 : vector<1x120x80xf32> to vector<120x80xf32>
    %cst_91 = arith.constant dense<0.000000e+00> : vector<16x80xf32>
    %106 = tpu.matmul %100, %105, %cst_91 {dimension_numbers = #tpu.dot_dimension_numbers<[1], [0], [0], [1], [0, 0, 1, 1], [], []>} : vector<16x120xf32>, vector<120x80xf32>, vector<16x80xf32> -> vector<16x80xf32>
    %107 = arith.addf %97, %103 : vector<16x80xf32>
    %108 = arith.addf %98, %106 : vector<16x80xf32>
    %109 = arith.maximumf %107, %108 : vector<16x80xf32>
    %110 = vector.shape_cast %109 : vector<16x80xf32> to vector<8x2x80xf32>
    %111 = vector.extract_strided_slice %110 {offsets = [0, 0, 0], sizes = [8, 1, 80], strides = [1, 1, 1]} : vector<8x2x80xf32> to vector<8x1x80xf32>
    %112 = vector.shape_cast %111 : vector<8x1x80xf32> to vector<8x80xf32>
    %113 = vector.extract_strided_slice %110 {offsets = [0, 1, 0], sizes = [8, 1, 80], strides = [1, 1, 1]} : vector<8x2x80xf32> to vector<8x1x80xf32>
    %114 = vector.shape_cast %113 : vector<8x1x80xf32> to vector<8x80xf32>
    %115 = arith.maximumf %112, %114 : vector<8x80xf32>
    %c0_92 = arith.constant 0 : index
    %c0_93 = arith.constant 0 : index
    %116 = vector.load %arg7[%c0_92, %c0_93] : memref<1x80xf32, #tpu.memory_space<vmem>>, vector<1x80xf32>
    %117 = vector.broadcast %116 : vector<1x80xf32> to vector<8x80xf32>
    %118 = arith.addf %115, %117 : vector<8x80xf32>
    %cst_94 = arith.constant 0.000000e+00 : f32
    %119 = vector.broadcast %cst_94 : f32 to vector<8x80xf32>
    %120 = arith.maximumf %118, %119 : vector<8x80xf32>
    %121 = vector.shape_cast %120 : vector<8x80xf32> to vector<2x4x80xf32>
    %122 = vector.extract_strided_slice %121 {offsets = [0, 0, 0], sizes = [2, 1, 80], strides = [1, 1, 1]} : vector<2x4x80xf32> to vector<2x1x80xf32>
    %123 = vector.shape_cast %122 : vector<2x1x80xf32> to vector<2x80xf32>
    %c0_95 = arith.constant 0 : index
    %c0_96 = arith.constant 0 : index
    %c0_97 = arith.constant 0 : index
    %124 = vector.load %arg8[%c0_95, %c0_96, %c0_97] : memref<4x80x128xf32, #tpu.memory_space<vmem>>, vector<1x80x128xf32>
    %125 = vector.shape_cast %124 : vector<1x80x128xf32> to vector<80x128xf32>
    %cst_98 = arith.constant dense<0.000000e+00> : vector<2x128xf32>
    %126 = tpu.matmul %123, %125, %cst_98 {dimension_numbers = #tpu.dot_dimension_numbers<[1], [0], [0], [1], [0, 0, 1, 1], [], []>} : vector<2x80xf32>, vector<80x128xf32>, vector<2x128xf32> -> vector<2x128xf32>
    %127 = vector.extract_strided_slice %121 {offsets = [0, 1, 0], sizes = [2, 1, 80], strides = [1, 1, 1]} : vector<2x4x80xf32> to vector<2x1x80xf32>
    %128 = vector.shape_cast %127 : vector<2x1x80xf32> to vector<2x80xf32>
    %c1_99 = arith.constant 1 : index
    %c0_100 = arith.constant 0 : index
    %c0_101 = arith.constant 0 : index
    %129 = vector.load %arg8[%c1_99, %c0_100, %c0_101] : memref<4x80x128xf32, #tpu.memory_space<vmem>>, vector<1x80x128xf32>
    %130 = vector.shape_cast %129 : vector<1x80x128xf32> to vector<80x128xf32>
    %cst_102 = arith.constant dense<0.000000e+00> : vector<2x128xf32>
    %131 = tpu.matmul %128, %130, %cst_102 {dimension_numbers = #tpu.dot_dimension_numbers<[1], [0], [0], [1], [0, 0, 1, 1], [], []>} : vector<2x80xf32>, vector<80x128xf32>, vector<2x128xf32> -> vector<2x128xf32>
    %132 = arith.addf %126, %131 : vector<2x128xf32>
    %133 = vector.extract_strided_slice %121 {offsets = [0, 2, 0], sizes = [2, 1, 80], strides = [1, 1, 1]} : vector<2x4x80xf32> to vector<2x1x80xf32>
    %134 = vector.shape_cast %133 : vector<2x1x80xf32> to vector<2x80xf32>
    %c2_103 = arith.constant 2 : index
    %c0_104 = arith.constant 0 : index
    %c0_105 = arith.constant 0 : index
    %135 = vector.load %arg8[%c2_103, %c0_104, %c0_105] : memref<4x80x128xf32, #tpu.memory_space<vmem>>, vector<1x80x128xf32>
    %136 = vector.shape_cast %135 : vector<1x80x128xf32> to vector<80x128xf32>
    %cst_106 = arith.constant dense<0.000000e+00> : vector<2x128xf32>
    %137 = tpu.matmul %134, %136, %cst_106 {dimension_numbers = #tpu.dot_dimension_numbers<[1], [0], [0], [1], [0, 0, 1, 1], [], []>} : vector<2x80xf32>, vector<80x128xf32>, vector<2x128xf32> -> vector<2x128xf32>
    %138 = arith.addf %132, %137 : vector<2x128xf32>
    %139 = vector.extract_strided_slice %121 {offsets = [0, 3, 0], sizes = [2, 1, 80], strides = [1, 1, 1]} : vector<2x4x80xf32> to vector<2x1x80xf32>
    %140 = vector.shape_cast %139 : vector<2x1x80xf32> to vector<2x80xf32>
    %c3_107 = arith.constant 3 : index
    %c0_108 = arith.constant 0 : index
    %c0_109 = arith.constant 0 : index
    %141 = vector.load %arg8[%c3_107, %c0_108, %c0_109] : memref<4x80x128xf32, #tpu.memory_space<vmem>>, vector<1x80x128xf32>
    %142 = vector.shape_cast %141 : vector<1x80x128xf32> to vector<80x128xf32>
    %cst_110 = arith.constant dense<0.000000e+00> : vector<2x128xf32>
    %143 = tpu.matmul %140, %142, %cst_110 {dimension_numbers = #tpu.dot_dimension_numbers<[1], [0], [0], [1], [0, 0, 1, 1], [], []>} : vector<2x80xf32>, vector<80x128xf32>, vector<2x128xf32> -> vector<2x128xf32>
    %144 = arith.addf %138, %143 : vector<2x128xf32>
    %c0_111 = arith.constant 0 : index
    %c0_112 = arith.constant 0 : index
    %145 = vector.load %arg9[%c0_111, %c0_112] : memref<1x128xf32, #tpu.memory_space<vmem>>, vector<1x128xf32>
    %146 = vector.broadcast %145 : vector<1x128xf32> to vector<2x128xf32>
    %147 = arith.addf %144, %146 : vector<2x128xf32>
    %cst_113 = arith.constant 0.000000e+00 : f32
    %148 = vector.broadcast %cst_113 : f32 to vector<2x128xf32>
    %149 = arith.maximumf %147, %148 : vector<2x128xf32>
    %c0_114 = arith.constant 0 : index
    %c0_115 = arith.constant 0 : index
    %150 = vector.load %arg10[%c0_114, %c0_115] : memref<128x128xf32, #tpu.memory_space<vmem>>, vector<128x128xf32>
    %cst_116 = arith.constant dense<0.000000e+00> : vector<2x128xf32>
    %151 = tpu.matmul %149, %150, %cst_116 {dimension_numbers = #tpu.dot_dimension_numbers<[1], [0], [0], [1], [0, 0, 1, 1], [], []>} : vector<2x128xf32>, vector<128x128xf32>, vector<2x128xf32> -> vector<2x128xf32>
    %c0_117 = arith.constant 0 : index
    %c0_118 = arith.constant 0 : index
    %152 = vector.load %arg11[%c0_117, %c0_118] : memref<1x128xf32, #tpu.memory_space<vmem>>, vector<1x128xf32>
    %153 = vector.broadcast %152 : vector<1x128xf32> to vector<2x128xf32>
    %154 = arith.addf %151, %153 : vector<2x128xf32>
    %c0_119 = arith.constant 0 : index
    %c0_120 = arith.constant 0 : index
    %155 = vector.load %arg12[%c0_119, %c0_120] : memref<2x128xf32, #tpu.memory_space<vmem>>, vector<2x128xf32>
    tpu.vector_store %arg12[%c0_119, %c0_120], %149 {strides = array<i32>} : memref<2x128xf32, #tpu.memory_space<vmem>>, vector<2x128xf32>,
    %c0_121 = arith.constant 0 : index
    %c0_122 = arith.constant 0 : index
    %156 = vector.load %arg13[%c0_121, %c0_122] : memref<2x128xf32, #tpu.memory_space<vmem>>, vector<2x128xf32>
    tpu.vector_store %arg13[%c0_121, %c0_122], %154 {strides = array<i32>} : memref<2x128xf32, #tpu.memory_space<vmem>>, vector<2x128xf32>,
    return
  }
  func.func @transform_0(%arg0: i32) -> (i32, i32, i32) {
    %c0_i32 = arith.constant 0 : i32
    %c0_i32_0 = arith.constant 0 : i32
    %c0_i32_1 = arith.constant 0 : i32
    return %arg0, %c0_i32, %c0_i32_0 : i32, i32, i32
  }
  func.func @transform_1(%arg0: i32) -> (i32, i32, i32) {
    %c0_i32 = arith.constant 0 : i32
    %c0_i32_0 = arith.constant 0 : i32
    %c0_i32_1 = arith.constant 0 : i32
    %c0_i32_2 = arith.constant 0 : i32
    return %c0_i32, %c0_i32_0, %c0_i32_1 : i32, i32, i32
  }
  func.func @transform_2(%arg0: i32) -> (i32, i32, i32) {
    %c0_i32 = arith.constant 0 : i32
    %c0_i32_0 = arith.constant 0 : i32
    %c0_i32_1 = arith.constant 0 : i32
    %c0_i32_2 = arith.constant 0 : i32
    return %c0_i32, %c0_i32_0, %c0_i32_1 : i32, i32, i32
  }
  func.func @transform_3(%arg0: i32) -> (i32, i32) {
    %c0_i32 = arith.constant 0 : i32
    %c0_i32_0 = arith.constant 0 : i32
    %c0_i32_1 = arith.constant 0 : i32
    return %c0_i32, %c0_i32_0 : i32, i32
  }
  func.func @transform_4(%arg0: i32) -> (i32, i32, i32) {
    %c0_i32 = arith.constant 0 : i32
    %c0_i32_0 = arith.constant 0 : i32
    %c0_i32_1 = arith.constant 0 : i32
    %c0_i32_2 = arith.constant 0 : i32
    return %c0_i32, %c0_i32_0, %c0_i32_1 : i32, i32, i32
  }
  func.func @transform_5(%arg0: i32) -> (i32, i32, i32) {
    %c0_i32 = arith.constant 0 : i32
    %c0_i32_0 = arith.constant 0 : i32
    %c0_i32_1 = arith.constant 0 : i32
    %c0_i32_2 = arith.constant 0 : i32
    return %c0_i32, %c0_i32_0, %c0_i32_1 : i32, i32, i32
  }
  func.func @transform_6(%arg0: i32) -> (i32, i32) {
    %c0_i32 = arith.constant 0 : i32
    %c0_i32_0 = arith.constant 0 : i32
    %c0_i32_1 = arith.constant 0 : i32
    return %c0_i32, %c0_i32_0 : i32, i32
  }
  func.func @transform_7(%arg0: i32) -> (i32, i32, i32) {
    %c0_i32 = arith.constant 0 : i32
    %c0_i32_0 = arith.constant 0 : i32
    %c0_i32_1 = arith.constant 0 : i32
    %c0_i32_2 = arith.constant 0 : i32
    return %c0_i32, %c0_i32_0, %c0_i32_1 : i32, i32, i32
  }
  func.func @transform_8(%arg0: i32) -> (i32, i32) {
    %c0_i32 = arith.constant 0 : i32
    %c0_i32_0 = arith.constant 0 : i32
    %c0_i32_1 = arith.constant 0 : i32
    return %c0_i32, %c0_i32_0 : i32, i32
  }
  func.func @transform_9(%arg0: i32) -> (i32, i32) {
    %c0_i32 = arith.constant 0 : i32
    %c0_i32_0 = arith.constant 0 : i32
    %c0_i32_1 = arith.constant 0 : i32
    return %c0_i32, %c0_i32_0 : i32, i32
  }
  func.func @transform_10(%arg0: i32) -> (i32, i32) {
    %c0_i32 = arith.constant 0 : i32
    %c0_i32_0 = arith.constant 0 : i32
    %c0_i32_1 = arith.constant 0 : i32
    return %c0_i32, %c0_i32_0 : i32, i32
  }
  func.func @transform_11(%arg0: i32) -> (i32, i32) {
    %c0_i32 = arith.constant 0 : i32
    %c0_i32_0 = arith.constant 0 : i32
    return %arg0, %c0_i32 : i32, i32
  }
  func.func @transform_12(%arg0: i32) -> (i32, i32) {
    %c0_i32 = arith.constant 0 : i32
    %c0_i32_0 = arith.constant 0 : i32
    return %arg0, %c0_i32 : i32, i32
  }
}

</mosaic_0001>

<bundles_post_ra>
// kernel: net_forward.1
= control target key start
LH: loop header
LB: loop body
LE: loop exit
PB: predicated region body
PF: predicated region fallthrough
CT: control target
= control target key end

     0   :  { %18 = vsyncpa [#allocation3], 0  ;;  %vm86_vm0 = vcmask 1043456   ;;  %vm5175_vm1 = vmmov 1   ;;  %vm67_vm3 = vcmask 228352   ;;  %s6706_s0 = inlined_call_operand.vmem [shape: f32[2,28,28], index: 0, kind: input, shape index: {}]   ;;  %s6707_s1 = inlined_call_operand.vmem [shape: f32[5,28,120], index: 1, kind: input, shape index: {}]   ;;  %s6708_s2 = inlined_call_operand.vmem [shape: f32[5,28,120], index: 2, kind: input, shape index: {}]   ;;  %s6709_s3 = inlined_call_operand.vmem [shape: f32[1,120], index: 3, kind: input, shape index: {}]   ;;  %s6710_s4 = inlined_call_operand.vmem [shape: f32[5,120,80], index: 4, kind: input, shape index: {}]   ;;  %s6711_s5 = inlined_call_operand.vmem [shape: f32[5,120,80], index: 5, kind: input, shape index: {}]   ;;  %s6712_s6 = inlined_call_operand.vmem [shape: f32[1,80], index: 6, kind: input, shape index: {}]   ;;  %s6713_s7 = inlined_call_operand.vmem [shape: f32[4,80,128], index: 7, kind: input, shape index: {}]   ;;  %s6714_s8 = inlined_call_operand.vmem [shape: f32[1,128], index: 8, kind: input, shape index: {}]   ;;  %s6715_s9 = inlined_call_operand.vmem [shape: f32[128,128], index: 9, kind: input, shape index: {}]   ;;  %s6716_s10 = inlined_call_operand.vmem [shape: f32[1,128], index: 10, kind: input, shape index: {}]   ;;  %s6717_s11 = inlined_call_operand.hbm [shape: f32[2,128], index: 11, kind: output, shape index: {0}]   ;;  %s6718_s12 = inlined_call_operand.hbm [shape: f32[2,128], index: 12, kind: output, shape index: {1}]  }
   0x1   :  { %v3322_v0 = vld [vmem:[%s6707_s1 + $0x20] sm:$0xff]  ;;  %v3323_v1 = vld [vmem:[%s6707_s1 + $0x28] sm:$0xff]  ;;  %v3324_v5 = vld [vmem:[%s6707_s1 + $0x30] sm:$0xff] }
   0x2   :  { %v48_v2 = vld [vmem:[%s6707_s1] sm:$0xff]  ;;  %v4592_v3 = vpack.c.bf16 %v3323_v1, %v3322_v0  ;;  %v49_v4 = vld [vmem:[%s6707_s1 + $0x8] sm:$0xff]  ;;  %v3325_v6 = vld [vmem:[%s6707_s1 + $0x38] sm:$0xf] }
   0x3   :  { %v4612_v7 = vpack.c.bf16 %v49_v4, %v48_v2  ;;  %v4596_v8 = vpack.c.bf16 %v3325_v6, %v3324_v5  ;;  %vm5265_vm2 = vmpackc.low %vm86_vm0, %vm5175_vm1  ;;  %v50_v10 = vld [vmem:[%s6707_s1 + $0x10] sm:$0xff]  ;;  %v51_v11 = vld [vmem:[%s6707_s1 + $0x18] sm:$0xf] }
   0x4   :  { %4593 = vmatprep.subr.bf16.mxu1 %v4592_v3  ;;  %v4616_v12 = vpack.c.bf16 %v51_v11, %v50_v10  ;;  %v5278_v13 = vld [vmem:[%s6706_s0 + $0x1] sm:$0xff]  ;;  %v3335_v21 = vld [vmem:[%s6708_s2 + $0x30] sm:$0xff]  ;;  %v3336_v22 = vld [vmem:[%s6708_s2 + $0x38] sm:$0xf] }
   0x5   :  { %4613 = vmatprep.subr.bf16.mxu0 %v4612_v7  ;;  %4595 = vmatpush3.bf16.msra.mxu1 %v4592_v3  ;;  %v5283_v14 = vld [vmem:[%s6706_s0] sm:$0xff]  ;;  %v3334_v16 = vld [vmem:[%s6708_s2 + $0x28] sm:$0xff]  ;;  %v3360_v25 = vld [vmem:[%s6707_s1 + $0x50] sm:$0xff]  ;;  %v4606_v29 = vpack.c.bf16 %v3336_v22, %v3335_v21 }
   0x6   :  { %v3333_v15 = vld [vmem:[%s6708_s2 + $0x20] sm:$0xff]  ;;  %4615 = vmatpush3.bf16.msra.mxu0 %v4612_v7  ;;  %4598 = vmatprep.subr.msk.bf16.mxu1 %vm5265_vm2, %v4596_v8  ;;  %v3359_v19 = vld [vmem:[%s6707_s1 + $0x48] sm:$0xff]  ;;  %v3361_v26 = vld [vmem:[%s6707_s1 + $0x58] sm:$0xf] }
   0x7   :  { %v4602_v17 = vpack.c.bf16 %v3334_v16, %v3333_v15  ;;  %4618 = vmatprep.subr.msk.bf16.mxu0 %vm5265_vm2, %v4616_v12  ;;  %3973 = vmatprep.mubr.msk.f32.mxu1 %vm67_vm3, %v5278_v13  ;;  %v3358_v18 = vld [vmem:[%s6707_s1 + $0x40] sm:$0xff]  ;;  %v57_v23 = vld [vmem:[%s6706_s0 + $0x9] sm:$0xff]  ;;  %v58_v27 = vld [vmem:[%s6706_s0 + $0x11] sm:$0xff]  ;;  %v4636_v30 = vpack.c.bf16 %v3361_v26, %v3360_v25 }
   0x8   :  { %4007 = vmatprep.mubr.msk.f32.mxu0 %vm67_vm3, %v5283_v14  ;;  %v4632_v20 = vpack.c.bf16 %v3359_v19, %v3358_v18  ;;  %v5321_v24 = vld [vmem:[%s6706_s0 + $0x8] sm:$0xff]  ;;  %v5335_v28 = vld [vmem:[%s6706_s0 + $0x10] sm:$0xff]  ;;  %v52_v31 = vld [vmem:[%s6708_s2] sm:$0xff] }
   0x9   :  { %4601 = vmatpush3.bf16.msk.msra.mxu1 %vm5265_vm2, %v4596_v8  ;;  %v53_v32 = vld [vmem:[%s6708_s2 + $0x8] sm:$0xff]  ;;  %v3380_v34 = vld [vmem:[%s6707_s1 + $0x60] sm:$0xff]  ;;  %v61_v41 = vld [vmem:[%s6706_s0 + $0x31] sm:$0xff] }
   0xa   :  { %4621 = vmatpush3.bf16.msk.msra.mxu0 %vm5265_vm2, %v4616_v12  ;;  %4603 = vmatprep.subr.bf16.mxu1 %v4602_v17  ;;  %v59_v33 = vld [vmem:[%s6706_s0 + $0x21] sm:$0xff]  ;;  %v60_v37 = vld [vmem:[%s6706_s0 + $0x29] sm:$0xff]  ;;  %v4622_v39 = vpack.c.bf16 %v53_v32, %v52_v31  ;;  %v55_v45 = vld [vmem:[%s6708_s2 + $0x18] sm:$0xf] }
   0xb   :  { %4633 = vmatprep.subr.bf16.mxu0 %v4632_v20  ;;  %v3381_v35 = vld [vmem:[%s6707_s1 + $0x68] sm:$0xff]  ;;  %v5361_v36 = vld [vmem:[%s6706_s0 + $0x20] sm:$0xff]  ;;  %v5389_v42 = vld [vmem:[%s6706_s0 + $0x30] sm:$0xff] }
   0xc   :  { %3974 = vmatmul.mubr.msk.f32.vlgmr.msra.gmra.mrb[0].mxu1 %vm67_vm3, %v57_v23  ;;  %v5371_v38 = vld [vmem:[%s6706_s0 + $0x28] sm:$0xff]  ;;  %v4652_v40 = vpack.c.bf16 %v3381_v35, %v3380_v34  ;;  %v54_v44 = vld [vmem:[%s6708_s2 + $0x10] sm:$0xff]  ;;  %v3383_v47 = vld [vmem:[%s6707_s1 + $0x78] sm:$0xf] }
   0xd   :  { %4008 = vmatmul.mubr.msk.f32.vlgmr.msra.gmra.mrb[0].mxu0 %vm67_vm3, %v5321_v24  ;;  %4605 = vmatpush3.bf16.msra.mxu1 %v4602_v17  ;;  %v5396_v43 = vld [vmem:[%s6706_s0 + $0x2] sm:$0xff]  ;;  %v3382_v46 = vld [vmem:[%s6707_s1 + $0x70] sm:$0xff]  ;;  %v4626_v50 = vpack.c.bf16 %v55_v45, %v54_v44 }
   0xe   :  { %3976 = vmatprep.mubr.msk.f32.mxu1 %vm67_vm3, %v58_v27  ;;  %4010 = vmatprep.mubr.msk.f32.mxu0 %vm67_vm3, %v5335_v28  ;;  %v5420_v48 = vld [vmem:[%s6706_s0 + $0xa] sm:$0xff]  ;;  %v5425_v49 = vld [vmem:[%s6706_s0 + $0x12] sm:$0xff]  ;;  %v4656_v51 = vpack.c.bf16 %v3383_v47, %v3382_v46  ;;  %v3369_v52 = vld [vmem:[%s6708_s2 + $0x40] sm:$0xff] }
   0xf   :  { %4635 = vmatpush3.bf16.msra.mxu0 %v4632_v20  ;;  %4608 = vmatprep.subr.msk.bf16.mxu1 %vm5265_vm2, %v4606_v29  ;;  %v3370_v53 = vld [vmem:[%s6708_s2 + $0x48] sm:$0xff] }
  0x10   :  { %3977 = vmatmul.mubr.msk.f32.gmra.mrb[2].mxu1 %vm67_vm3, %v59_v33  ;;  %4638 = vmatprep.subr.msk.bf16.mxu0 %vm5265_vm2, %v4636_v30 }
  0x11   :  { %4011 = vmatmul.mubr.msk.f32.gmra.mrb[2].mxu0 %vm67_vm3, %v5361_v36  ;;  %3979 = vmatprep.mubr.msk.f32.mxu1 %vm67_vm3, %v60_v37 }
  0x12   :  { %4611 = vmatpush3.bf16.msk.msra.mxu1 %vm5265_vm2, %v4606_v29  ;;  %4013 = vmatprep.mubr.msk.f32.mxu0 %vm67_vm3, %v5371_v38 }
  0x13   :  { %4641 = vmatpush3.bf16.msk.msra.mxu0 %vm5265_vm2, %v4636_v30  ;;  %4623 = vmatprep.subr.bf16.mxu1 %v4622_v39 }
  0x14   :  { %3980 = vmatmul.mubr.msk.f32.gmra.mrb[4].mxu1 %vm67_vm3, %v61_v41  ;;  %4653 = vmatprep.subr.bf16.mxu0 %v4652_v40 }
  0x15   :  { %4014 = vmatmul.mubr.msk.f32.gmra.mrb[4].mxu0 %vm67_vm3, %v5389_v42  ;;  %3990 = vmatprep.mubr.msk.f32.mxu1 %vm67_vm3, %v5278_v13 }
  0x16   :  { %4041 = vmatprep.mubr.msk.f32.mxu0 %vm67_vm3, %v5396_v43 }
  0x18   :  { %3991 = vmatmul.mubr.msk.f32.vlgmr.msra.gmra.mrb[6].mxu1 %vm67_vm3, %v57_v23 }
  0x19   :  { %19 = vsyncpa [#allocation5], 0  ;;  %4042 = vmatmul.mubr.msk.f32.vlgmr.msra.gmra.mrb[0].mxu0 %vm67_vm3, %v5420_v48  ;;  %4625 = vmatpush3.bf16.msra.mxu1 %v4622_v39  ;;  %v3402_v54 = vld [vmem:[%s6707_s1 + $0x80] sm:$0xff]  ;;  %v3403_v55 = vld [vmem:[%s6707_s1 + $0x88] sm:$0xff]  ;;  %v4642_v58 = vpack.c.bf16 %v3370_v53, %v3369_v52  ;;  %vm1671_vm4 = vcmask 1041409   ;;  %vm1673_vm5 = vcmask 1042434  }
  0x1a   :  { %3993 = vmatprep.mubr.msk.f32.mxu1 %vm67_vm3, %v58_v27  ;;  %4044 = vmatprep.mubr.msk.f32.mxu0 %vm67_vm3, %v5425_v49  ;;  %v5448_v56 = vld [vmem:[%s6706_s0 + $0x22] sm:$0xff]  ;;  %v5455_v57 = vld [vmem:[%s6706_s0 + $0x2a] sm:$0xff]  ;;  %v4672_v59 = vpack.c.bf16 %v3403_v55, %v3402_v54  ;;  %v5470_v60 = vld [vmem:[%s6706_s0 + $0x32] sm:$0xff]  ;;  %vm1675_vm6 = vcmask 1043459   ;;  %vm1679_vm7 = vcmask 1045509   ;;  %vm1677_vm8 = vcmask 1044484  }
  0x1b   :  { %4655 = vmatpush3.bf16.msra.mxu0 %v4652_v40  ;;  %4628 = vmatprep.subr.msk.bf16.mxu1 %vm5265_vm2, %v4626_v50  ;;  %v5477_v61 = vld [vmem:[%s6706_s0 + $0x3] sm:$0xff]  ;;  %v3371_v62 = vld [vmem:[%s6708_s2 + $0x50] sm:$0xff]  ;;  %v3372_v63 = vld [vmem:[%s6708_s2 + $0x58] sm:$0xf]  ;;  %vm1681_vm9 = vcmask 1046534   ;;  %vm1683_vm10 = vcmask 1047559  }
  0x1c   :  { %3994 = vmatmul.mubr.msk.f32.gmra.mrb[8].mxu1 %vm67_vm3, %v59_v33  ;;  %4658 = vmatprep.subr.msk.bf16.mxu0 %vm5265_vm2, %v4656_v51  ;;  %v3404_v0 = vld [vmem:[%s6707_s1 + $0x90] sm:$0xff]  ;;  %v3405_v1 = vld [vmem:[%s6707_s1 + $0x98] sm:$0xf]  ;;  %v4646_v4 = vpack.c.bf16 %v3372_v63, %v3371_v62  ;;  %v3391_v6 = vld [vmem:[%s6708_s2 + $0x60] sm:$0xff]  ;;  %vm1692_vm11 = vcmask 982016   ;;  %vm5178_vm12 = vmmov 0  }
  0x1d   :  { %4045 = vmatmul.mubr.msk.f32.gmra.mrb[2].mxu0 %vm67_vm3, %v5448_v56  ;;  %3996 = vmatprep.mubr.msk.f32.mxu1 %vm67_vm3, %v60_v37  ;;  %v745_v2 = vld [vmem:[%s6706_s0 + $0xb] sm:$0xff]  ;;  %v746_v3 = vld [vmem:[%s6706_s0 + $0x13] sm:$0xff]  ;;  %v4676_v5 = vpack.c.bf16 %v3405_v1, %v3404_v0  ;;  %v747_v8 = vld [vmem:[%s6706_s0 + $0x23] sm:$0xff]  ;;  %vm2844_vm13 = vcmask 654336  }
  0x1e   :  { %4631 = vmatpush3.bf16.msk.msra.mxu1 %vm5265_vm2, %v4626_v50  ;;  %4047 = vmatprep.mubr.msk.f32.mxu0 %vm67_vm3, %v5455_v57  ;;  %v3392_v7 = vld [vmem:[%s6708_s2 + $0x68] sm:$0xff]  ;;  %v749_v12 = vld [vmem:[%s6706_s0 + $0x33] sm:$0xff]  ;;  %v3413_v19 = vld [vmem:[%s6708_s2 + $0x80] sm:$0xff] }
  0x1f   :  { %4661 = vmatpush3.bf16.msk.msra.mxu0 %vm5265_vm2, %v4656_v51  ;;  %4643 = vmatprep.subr.bf16.mxu1 %v4642_v58  ;;  %v748_v10 = vld [vmem:[%s6706_s0 + $0x2b] sm:$0xff]  ;;  %v4662_v11 = vpack.c.bf16 %v3392_v7, %v3391_v6  ;;  %v3394_v15 = vld [vmem:[%s6708_s2 + $0x78] sm:$0xf]  ;;  %v3450_v9 = vld [vmem:[%s6710_s4 + $0x80] sm:$0xff] }
  0x20   :  { %3997 = vmatmul.mubr.msk.f32.gmra.mrb[10].mxu1 %vm67_vm3, %v61_v41  ;;  %4673 = vmatprep.subr.bf16.mxu0 %v4672_v59  ;;  %v986_v13 = vld [vmem:[%s6706_s0 + $0x4] sm:$0xff]  ;;  %v987_v16 = vld [vmem:[%s6706_s0 + $0xc] sm:$0xff]  ;;  %v988_v17 = vld [vmem:[%s6706_s0 + $0x14] sm:$0xff] }
  0x21   :  { %4048 = vmatmul.mubr.msk.f32.gmra.mrb[4].mxu0 %vm67_vm3, %v5470_v60  ;;  %4024 = vmatprep.mubr.msk.f32.mxu1 %vm67_vm3, %v5283_v14  ;;  %v3393_v14 = vld [vmem:[%s6708_s2 + $0x70] sm:$0xff]  ;;  %v3414_v20 = vld [vmem:[%s6708_s2 + $0x88] sm:$0xff]  ;;  %v3416_v26 = vld [vmem:[%s6708_s2 + $0x98] sm:$0xf] }
  0x22   :  { %4075 = vmatprep.mubr.msk.f32.mxu0 %vm67_vm3, %v5477_v61  ;;  %v4666_v18 = vpack.c.bf16 %v3394_v15, %v3393_v14  ;;  %v989_v21 = vld [vmem:[%s6706_s0 + $0x24] sm:$0xff]  ;;  %v990_v22 = vld [vmem:[%s6706_s0 + $0x2c] sm:$0xff]  ;;  %v4682_v23 = vpack.c.bf16 %v3414_v20, %v3413_v19  ;;  %v3466_v29 = vld [vmem:[%s6711_s5 + $0x78] sm:$0xff] }
  0x23   :  { %v3415_v25 = vld [vmem:[%s6708_s2 + $0x90] sm:$0xff]  ;;  %v3467_v31 = vld [vmem:[%s6711_s5 + $0x80] sm:$0xff]  ;;  %v3451_v33 = vld [vmem:[%s6710_s4 + $0x88] sm:$0xff] }
  0x24   :  { %4025 = vmatmul.mubr.msk.f32.vlgmr.msra.gmra.mrb[6].mxu1 %vm67_vm3, %v5321_v24  ;;  %v991_v24 = vld [vmem:[%s6706_s0 + $0x34] sm:$0xff]  ;;  %v4686_v27 = vpack.c.bf16 %v3416_v26, %v3415_v25  ;;  %v4720_v32 = vpack.c.bf16 %v3467_v31, %v3466_v29  ;;  %v3468_v35 = vld [vmem:[%s6711_s5 + $0x88] sm:$0xff]  ;;  %v3454_v40 = vld [vmem:[%s6710_s4 + $0xa0] sm:$0xff] }
  0x25   :  { %4076 = vmatmul.mubr.msk.f32.vlgmr.msra.gmra.mrb[0].mxu0 %vm67_vm3, %v745_v2  ;;  %4645 = vmatpush3.bf16.msra.mxu1 %v4642_v58  ;;  %v3452_v34 = vld [vmem:[%s6710_s4 + $0x90] sm:$0xff]  ;;  %v3453_v39 = vld [vmem:[%s6710_s4 + $0x98] sm:$0xff]  ;;  %v3455_v45 = vld [vmem:[%s6710_s4 + $0xa8] sm:$0xff] }
  0x26   :  { %4027 = vmatprep.mubr.msk.f32.mxu1 %vm67_vm3, %v5335_v28  ;;  %4078 = vmatprep.mubr.msk.f32.mxu0 %vm67_vm3, %v746_v3  ;;  %v3449_v28 = vld [vmem:[%s6710_s4 + $0x78] sm:$0xff]  ;;  %v3469_v37 = vld [vmem:[%s6711_s5 + $0x90] sm:$0xff]  ;;  %v3472_v47 = vld [vmem:[%s6711_s5 + $0xa8] sm:$0xff] }
  0x27   :  { %4675 = vmatpush3.bf16.msra.mxu0 %v4672_v59  ;;  %4648 = vmatprep.subr.msk.bf16.mxu1 %vm5265_vm2, %v4646_v4  ;;  %v4692_v30 = vpack.c.bf16 %v3450_v9, %v3449_v28  ;;  %v3470_v41 = vld [vmem:[%s6711_s5 + $0x98] sm:$0xff]  ;;  %v3456_v46 = vld [vmem:[%s6710_s4 + $0xb0] sm:$0xff]  ;;  %v3458_v52 = vld [vmem:[%s6710_s4 + $0xc0] sm:$0xff]  ;;  %v5176_v9 = vmov 1983009808  }
  0x28   :  { %4028 = vmatmul.mubr.msk.f32.gmra.mrb[8].mxu1 %vm67_vm3, %v5361_v36  ;;  %4678 = vmatprep.subr.msk.bf16.mxu0 %vm5265_vm2, %v4676_v5  ;;  %v4696_v36 = vpack.c.bf16 %v3452_v34, %v3451_v33  ;;  %v3457_v51 = vld [vmem:[%s6710_s4 + $0xb8] sm:$0xff]  ;;  %v3475_v55 = vld [vmem:[%s6711_s5 + $0xc0] sm:$0xff]  ;;  %v3460_v58 = vld [vmem:[%s6710_s4 + $0xd0] sm:$0xff]  ;;  %v1242_v29 = vunpack.c.l.s4 %v5176_v9 }
  0x29   :  { %4079 = vmatmul.mubr.msk.f32.gmra.mrb[2].mxu0 %vm67_vm3, %v747_v8  ;;  %4030 = vmatprep.mubr.msk.f32.mxu1 %vm67_vm3, %v5371_v38  ;;  %v4724_v38 = vpack.c.bf16 %v3469_v37, %v3468_v35  ;;  %v3474_v53 = vld [vmem:[%s6711_s5 + $0xb8] sm:$0xff]  ;;  %v4708_v54 = vpack.c.bf16 %v3458_v52, %v3457_v51  ;;  %v3476_v59 = vld [vmem:[%s6711_s5 + $0xc8] sm:$0xff]  ;;  %v3462_v0 = vld [vmem:[%s6710_s4 + $0xe0] sm:$0xff] }
  0x2a   :  { %4651 = vmatpush3.bf16.msk.msra.mxu1 %vm5265_vm2, %v4646_v4  ;;  %4081 = vmatprep.mubr.msk.f32.mxu0 %vm67_vm3, %v748_v10  ;;  %v3461_v63 = vld [vmem:[%s6710_s4 + $0xd8] sm:$0xff]  ;;  %v3480_v6 = vld [vmem:[%s6711_s5 + $0xe8] sm:$0xff]  ;;  %v1545_v7 = vld [vmem:[%s6710_s4] sm:$0xff]  ;;  %v1243_v35 = vunpack.c.0.s8 %v1242_v29 }
  0x2b   :  { %4681 = vmatpush3.bf16.msk.msra.mxu0 %vm5265_vm2, %v4676_v5  ;;  %4663 = vmatprep.subr.bf16.mxu1 %v4662_v11  ;;  %v3478_v1 = vld [vmem:[%s6711_s5 + $0xd8] sm:$0xff]  ;;  %v3463_v5 = vld [vmem:[%s6710_s4 + $0xe8] sm:$0xff]  ;;  %v3448_v34 = vld [vmem:[%s6709_s3] ss:$0 sm:$0xff] }
  0x2c   :  { %4031 = vmatmul.mubr.msk.f32.gmra.mrb[10].mxu1 %vm67_vm3, %v5389_v42  ;;  %4693 = vmatprep.subr.bf16.mxu0 %v4692_v30  ;;  %v4700_v42 = vpack.c.bf16 %v3454_v40, %v3453_v39  ;;  %v1468_v37 = vcombine.high %v3448_v34, %v3448_v34  ;;  %v1563_v29 = vld [vmem:[%s6711_s5 + $0x18] sm:$0xff] }
  0x2d   :  { %4082 = vmatmul.mubr.msk.f32.gmra.mrb[4].mxu0 %vm67_vm3, %v749_v12  ;;  %4058 = vmatprep.mubr.msk.f32.mxu1 %vm67_vm3, %v5396_v43  ;;  %v3471_v43 = vld [vmem:[%s6711_s5 + $0xa0] sm:$0xff] }
  0x2e   :  { %4109 = vmatprep.mubr.msk.f32.mxu0 %vm67_vm3, %v986_v13  ;;  %v4728_v44 = vpack.c.bf16 %v3471_v43, %v3470_v41 }
  0x30   :  { %4059 = vmatmul.mubr.msk.f32.vlgmr.msra.gmra.mrb[6].mxu1 %vm67_vm3, %v5420_v48  ;;  %v4704_v48 = vpack.c.bf16 %v3456_v46, %v3455_v45 }
  0x31   :  { %4110 = vmatmul.mubr.msk.f32.vlgmr.msra.gmra.mrb[0].mxu0 %vm67_vm3, %v987_v16  ;;  %4665 = vmatpush3.bf16.msra.mxu1 %v4662_v11  ;;  %v1561_v11 = vld [vmem:[%s6711_s5 + $0x8] sm:$0xff] }
  0x32   :  { %4061 = vmatprep.mubr.msk.f32.mxu1 %vm67_vm3, %v5425_v49  ;;  %4112 = vmatprep.mubr.msk.f32.mxu0 %vm67_vm3, %v988_v17  ;;  %v3473_v49 = vld [vmem:[%s6711_s5 + $0xb0] sm:$0xff] }
  0x33   :  { %4668 = vmatprep.subr.msk.bf16.mxu1 %vm5265_vm2, %v4666_v18  ;;  %4695 = vmatpush3.bf16.msra.mxu0 %v4692_v30  ;;  %v4732_v50 = vpack.c.bf16 %v3473_v49, %v3472_v47  ;;  %v1244_v30 = vlaneseq }
  0x34   :  { %4062 = vmatmul.mubr.msk.f32.gmra.mrb[8].mxu1 %vm67_vm3, %v5448_v56  ;;  %4697 = vmatprep.subr.bf16.mxu0 %v4696_v36  ;;  %v4736_v56 = vpack.c.bf16 %v3475_v55, %v3474_v53 }
  0x35   :  { %4113 = vmatmul.mubr.msk.f32.gmra.mrb[2].mxu0 %vm67_vm3, %v989_v21  ;;  %4064 = vmatprep.mubr.msk.f32.mxu1 %vm67_vm3, %v5455_v57  ;;  %v3459_v57 = vld [vmem:[%s6710_s4 + $0xc8] sm:$0xff] }
  0x36   :  { %4671 = vmatpush3.bf16.msk.msra.mxu1 %vm5265_vm2, %v4666_v18  ;;  %4115 = vmatprep.mubr.msk.f32.mxu0 %vm67_vm3, %v990_v22 }
  0x37   :  { %4683 = vmatprep.subr.bf16.mxu1 %v4682_v23  ;;  %4699 = vmatpush3.bf16.msra.mxu0 %v4696_v36  ;;  %v1245_v36 = vshrl.u32 %v1244_v30, 7  ;;  %v1549_v30 = vld [vmem:[%s6710_s4 + $0x20] sm:$0xff] }
  0x38   :  { %4065 = vmatmul.mubr.msk.f32.gmra.mrb[10].mxu1 %vm67_vm3, %v5470_v60  ;;  %4701 = vmatprep.subr.bf16.mxu0 %v4700_v42  ;;  %v4712_v60 = vpack.c.bf16 %v3460_v58, %v3459_v57 }
  0x39   :  { %4116 = vmatmul.mubr.msk.f32.gmra.mrb[4].mxu0 %vm67_vm3, %v991_v24  ;;  %4092 = vmatprep.mubr.msk.f32.mxu1 %vm67_vm3, %v5477_v61  ;;  %v3477_v61 = vld [vmem:[%s6711_s5 + $0xd0] sm:$0xff]  ;;  %v5758_v52 = vsub.s32 0, %v1245_v36 }
  0x3a   :  { %v4740_v62 = vpack.c.bf16 %v3477_v61, %v3476_v59 }
  0x3b   :  { %4703 = vmatpush3.bf16.msra.mxu0 %v4700_v42 }
  0x3c   :  { %4093 = vmatmul.mubr.msk.f32.vlgmr.msra.gmra.mrb[6].mxu1 %vm67_vm3, %v745_v2  ;;  %4705 = vmatprep.subr.bf16.mxu0 %v4704_v48  ;;  %v4716_v2 = vpack.c.bf16 %v3462_v0, %v3461_v63 }
  0x3d   :  { %4685 = vmatpush3.bf16.msra.mxu1 %v4682_v23  ;;  %4095 = vmatprep.mubr.msk.f32.mxu1 %vm67_vm3, %v746_v3  ;;  %v3479_v3 = vld [vmem:[%s6711_s5 + $0xe0] sm:$0xff] }
  0x3e   :  { %4688 = vmatprep.subr.msk.bf16.mxu1 %vm5265_vm2, %v4686_v27  ;;  %v4744_v4 = vpack.c.bf16 %v3479_v3, %v3478_v1 }
  0x3f   :  { %4707 = vmatpush3.bf16.msra.mxu0 %v4704_v48 }
  0x40   :  { %4096 = vmatmul.mubr.msk.f32.gmra.mrb[8].mxu1 %vm67_vm3, %v747_v8  ;;  %4709 = vmatprep.subr.bf16.mxu0 %v4708_v54  ;;  %v1546_v8 = vld [vmem:[%s6710_s4 + $0x8] sm:$0xff] }
  0x41   :  { %4098 = vmatprep.mubr.msk.f32.mxu1 %vm67_vm3, %v748_v10  ;;  %4691 = vmatpush3.bf16.msk.msra.mxu1 %vm5265_vm2, %v4686_v27  ;;  %v1560_v10 = vld [vmem:[%s6711_s5] sm:$0xff] }
  0x42   :  { %4721 = vmatprep.subr.bf16.mxu1 %v4720_v32 }
  0x43   :  { %4711 = vmatpush3.bf16.msra.mxu0 %v4708_v54 }
  0x44   :  { %4099 = vmatmul.mubr.msk.f32.gmra.mrb[10].mxu1 %vm67_vm3, %v749_v12  ;;  %4713 = vmatprep.subr.bf16.mxu0 %v4712_v60  ;;  %v5719_v12 = vpack.c.bf16 %v1546_v8, %v1545_v7 }
  0x45   :  { %4126 = vmatprep.mubr.msk.f32.mxu1 %vm67_vm3, %v986_v13  ;;  %v5721_v13 = vpack.c.bf16 %v1561_v11, %v1560_v10 }
  0x47   :  { %4715 = vmatpush3.bf16.msra.mxu0 %v4712_v60 }
  0x48   :  { %4127 = vmatmul.mubr.msk.f32.vlgmr.msra.gmra.mrb[6].mxu1 %vm67_vm3, %v987_v16  ;;  %4717 = vmatprep.subr.bf16.mxu0 %v4716_v2 }
  0x49   :  { %4129 = vmatprep.mubr.msk.f32.mxu1 %vm67_vm3, %v988_v17  ;;  %4723 = vmatpush3.bf16.msra.mxu1 %v4720_v32 }
  0x4a   :  { %4725 = vmatprep.subr.bf16.mxu1 %v4724_v38 }
  0x4b   :  { %4719 = vmatpush3.bf16.msra.mxu0 %v4716_v2 }
  0x4c   :  { %4130 = vmatmul.mubr.msk.f32.gmra.mrb[8].mxu1 %vm67_vm3, %v989_v21  ;;  %4163 = vmatprep.subr.mxu0 %v3463_v5 }
  0x4d   :  { %4132 = vmatprep.mubr.msk.f32.mxu1 %vm67_vm3, %v990_v22  ;;  %4727 = vmatpush3.bf16.msra.mxu1 %v4724_v38  ;;  %v5732_v38 = vsub.s32 %v1243_v35, %v1245_v36 }
  0x4e   :  { %4729 = vmatprep.subr.bf16.mxu1 %v4728_v44 }
  0x4f   :  { %4164 = vmatpush3.msra.mxu0 %v3463_v5  ;;  %v5735_v39 = vrot.slane %v1468_v37, %v5732_v38  ;;  %v5738_v40 = vrot.slane %v3448_v34, %v5732_v38 }
  0x50   :  { %4133 = vmatmul.mubr.msk.f32.gmra.mrb[10].mxu1 %vm67_vm3, %v991_v24  ;;  %4749 = vmatprep.subr.bf16.mxu0 %v5719_v12 }
  0x51   :  { %4731 = vmatpush3.bf16.msra.mxu1 %v4728_v44  ;;  %v5742_v41 = vcombine.high %v5735_v39, %v5735_v39  ;;  %v5746_v43 = vcombine.high %v5738_v40, %v5738_v40  ;;  %v5749_v46 = vrot.slane %v5735_v39, 1  ;;  %v5756_v51 = vrot.slane %v5738_v40, 1 }
  0x52   :  { %4733 = vmatprep.subr.bf16.mxu1 %v4732_v50 }
  0x53   :  { %v5762_v55 = vrot.slane %v5746_v43, 1 }
  0x55   :  { %4735 = vmatpush3.bf16.msra.mxu1 %v4732_v50  ;;  %v5753_v50 = vrot.slane %v5742_v41, 1 }
  0x56   :  { %4737 = vmatprep.subr.bf16.mxu1 %v4736_v56 }
  0x59   :  { %4739 = vmatpush3.bf16.msra.mxu1 %v4736_v56 }
  0x5a   :  { %4741 = vmatprep.subr.bf16.mxu1 %v4740_v62 }
  0x5d   :  { %4743 = vmatpush3.bf16.msra.mxu1 %v4740_v62 }
  0x5e   :  { %4745 = vmatprep.subr.bf16.mxu1 %v4744_v4 }
  0x61   :  { %4747 = vmatpush3.bf16.msra.mxu1 %v4744_v4 }
  0x62   :  { %4196 = vmatprep.subr.mxu1 %v3480_v6 }
  0x65   :  { %4197 = vmatpush3.msra.mxu1 %v3480_v6 }
  0x66   :  { %4777 = vmatprep.subr.bf16.mxu1 %v5721_v13 }
  0xdf   :  { %v3975_v14 = vpop.f32.mrb[0].mxu1 }
  0xe0   :  { %v156_v15 = vpop.f32.mrb[1].mxu1 }
  0xe3   :  { %v3978_v16 = vpop.f32.mrb[2].mxu1 }
  0xe4   :  { %v166_v17 = vpop.f32.mrb[3].mxu1 }
  0xe7   :  { %v3981_v18 = vpop.f32.mrb[4].mxu1 }
  0xe8   :  { %v176_v19 = vpop.f32.mrb[5].mxu1 }
 0x104   :  { %v4111_v20 = vpop.f32.mrb[0].mxu0 }
 0x105   :  { %v5056_v21 = vadd.f32 %v4111_v20, %v3975_v14  ;;  %v1084_v22 = vpop.f32.mrb[1].mxu0 }
 0x106   :  { %v5057_v23 = vadd.f32 %v1084_v22, %v156_v15 }
 0x108   :  { %v4114_v24 = vpop.f32.mrb[2].mxu0 }
 0x109   :  { %v5058_v25 = vadd.f32 %v4114_v24, %v3978_v16  ;;  %v1094_v26 = vpop.f32.mrb[3].mxu0  ;;  %v1548_v24 = vld [vmem:[%s6710_s4 + $0x18] sm:$0xff] }
 0x10a   :  { %v5059_v27 = vadd.f32 %v1094_v26, %v166_v17 }
 0x10c   :  { %v4117_v28 = vpop.f32.mrb[4].mxu0 }
 0x10d   :  { %v5725_v31 = vadd.f32 %v4117_v28, %v3981_v18  ;;  %v1104_v32 = vpop.f32.mrb[5].mxu0 }
 0x10e   :  { %v5727_v33 = vadd.f32 %v1104_v32, %v176_v19  ;;  %v1550_v32 = vld [vmem:[%s6710_s4 + $0x28] sm:$0xff] }
 0x11b   :  { %v4128_v42 = vpop.f32.mrb[6].mxu1 }
 0x11c   :  { %v1229_v44 = vmax.f32 %v5056_v21, %v4128_v42  ;;  %v1187_v45 = vpop.f32.mrb[7].mxu1  ;;  %v1564_v42 = vld [vmem:[%s6711_s5 + $0x20] sm:$0xff] }
 0x11d   :  { %v1228_v47 = vmax.f32 %v5057_v23, %v1187_v45  ;;  %v1547_v23 = vld [vmem:[%s6710_s4 + $0x10] sm:$0xff] }
 0x11e   :  { %v1257_v48 = vcombine.high %v1229_v44, %v1229_v44  ;;  %v1264_v49 = vrot.slane %v1229_v44, %v5732_v38  ;;  %v1565_v44 = vld [vmem:[%s6711_s5 + $0x28] sm:$0xff] }
 0x11f   :  { %v1240_v53 = vcombine.high %v1228_v47, %v1228_v47  ;;  %v1247_v54 = vrot.slane %v1228_v47, %v5732_v38  ;;  %v4131_v56 = vpop.f32.mrb[8].mxu1 }
 0x120   :  { %v1271_v57 = vrot.slane %v1257_v48, %v5732_v38  ;;  %v1272_v58 = vcombine.high %v1264_v49, %v1264_v49  ;;  %v3428_v59 = vrot.slane %v1264_v49, 9  ;;  %v1231_v60 = vmax.f32 %v5058_v25, %v4131_v56  ;;  %v1197_v61 = vpop.f32.mrb[9].mxu1  ;;  %v1562_v25 = vld [vmem:[%s6711_s5 + $0x10] sm:$0xff] }
 0x121   :  { %v1254_v62 = vrot.slane %v1240_v53, %v5732_v38  ;;  %v1255_v63 = vcombine.high %v1247_v54, %v1247_v54  ;;  %v3424_v0 = vrot.slane %v1247_v54, 9  ;;  %v1230_v1 = vmax.f32 %v5059_v27, %v1197_v61 }
 0x122   :  { %v1273_v2 = vcombine.high %v1271_v57, %v1271_v57  ;;  %v3429_v3 = vrot.slane %v1272_v58, 9  ;;  %v3430_v4 = vrot.slane %v1271_v57, 9  ;;  %v1442_v5 = vmax.f32 %v1264_v49, %v3428_v59 }
 0x123   :  { %v1256_v6 = vcombine.high %v1254_v62, %v1254_v62  ;;  %v3425_v7 = vrot.slane %v1255_v63, 9  ;;  %v3426_v8 = vrot.slane %v1254_v62, 9  ;;  %v1438_v10 = vmax.f32 %v1247_v54, %v3424_v0  ;;  %v4134_v11 = vpop.f32.mrb[10].mxu1 }
 0x124   :  { %v3431_v14 = vrot.slane %v1273_v2, 9  ;;  %v1443_v15 = vmax.f32 %v1272_v58, %v3429_v3  ;;  %v1444_v16 = vmax.f32 %v1271_v57, %v3430_v4  ;;  %v1501_v17 = vadd.f32 %v5735_v39, %v1442_v5  ;;  %v5767_v18 = vpop.f32.mrb[11].mxu1 }
 0x125   :  { %v3427_v19 = vrot.slane %v1256_v6, 9  ;;  %v1439_v20 = vmax.f32 %v1255_v63, %v3425_v7  ;;  %v1440_v21 = vmax.f32 %v1254_v62, %v3426_v8  ;;  %v1497_v22 = vadd.f32 %v5738_v40, %v1438_v10 }
 0x126   :  { %v1445_v26 = vmax.f32 %v1273_v2, %v3431_v14  ;;  %v1502_v27 = vadd.f32 %v5749_v46, %v1443_v15  ;;  %v1503_v28 = vadd.f32 %v5742_v41, %v1444_v16  ;;  %v1525_v9 = vmax.f32 %v1501_v17, 0.0 }
 0x127   :  { %v1441_v34 = vmax.f32 %v1256_v6, %v3427_v19  ;;  %v1498_v35 = vadd.f32 %v5756_v51, %v1439_v20  ;;  %v1499_v36 = vadd.f32 %v5746_v43, %v1440_v21  ;;  %v1521_v37 = vmax.f32 %v1497_v22, 0.0 }
 0x128   :  { %v1504_v45 = vadd.f32 %v5753_v50, %v1445_v26  ;;  %v1526_v47 = vmax.f32 %v1502_v27, 0.0  ;;  %v5799_v48 = vpack.c.bf16 %v1548_v24, %v1547_v23  ;;  %v5802_v54 = vpack.c.bf16 %v1563_v29, %v1562_v25 }
 0x129   :  { %v1500_v49 = vadd.f32 %v5762_v55, %v1441_v34  ;;  %v1522_v53 = vmax.f32 %v1498_v35, 0.0  ;;  %v5804_v56 = vpack.c.bf16 %v1550_v32, %v1549_v30  ;;  %v1527_v57 = vmax.f32 %v1503_v28, 0.0 }
 0x12a   :  { %v5807_v58 = vrot.slane %v1525_v9, %v5758_v52  ;;  %v1291_v59 = vcombine.high %v1231_v60, %v1231_v60  ;;  %v5809_v61 = vpack.c.bf16 %v1565_v44, %v1564_v42  ;;  %v1528_v62 = vmax.f32 %v1504_v45, 0.0 }
 0x12b   :  { %v1523_v63 = vmax.f32 %v1499_v36, 0.0  ;;  %v1868_v0 = vrot.slane %v1521_v37, %v5758_v52  ;;  %v1298_v2 = vrot.slane %v1231_v60, %v5732_v38  ;;  %v5814_v3 = vrot.slane %v1526_v47, %v5758_v52 }
 0x12c   :  { %v1305_v4 = vrot.slane %v1291_v59, %v5732_v38  ;;  %v1274_v5 = vcombine.high %v1230_v1, %v1230_v1  ;;  %v1281_v6 = vrot.slane %v1230_v1, %v5732_v38  ;;  %v1524_v7 = vmax.f32 %v1500_v49, 0.0 }
 0x12d   :  { %v5819_v8 = vrot.slane %v1522_v53, %v5758_v52  ;;  %v1306_v10 = vcombine.high %v1298_v2, %v1298_v2  ;;  %v3436_v14 = vrot.slane %v1298_v2, 9  ;;  %v1233_v22 = vmax.f32 %v5725_v31, %v4134_v11 }
 0x12e   :  { %v1307_v15 = vcombine.high %v1305_v4, %v1305_v4  ;;  %v3438_v16 = vrot.slane %v1305_v4, 9  ;;  %v1288_v17 = vrot.slane %v1274_v5, %v5732_v38  ;;  %v1289_v19 = vcombine.high %v1281_v6, %v1281_v6 }
 0x12f   :  { %v3437_v60 = vrot.slane %v1306_v10, 9  ;;  %v1450_v20 = vmax.f32 %v1298_v2, %v3436_v14  ;;  %v3432_v21 = vrot.slane %v1281_v6, 9  ;;  %v5824_v23 = vrot.slane %v1527_v57, %v5758_v52 }
 0x130   :  { %v5827_v1 = vrot.slane %v1523_v63, %v5758_v52  ;;  %v3439_v24 = vrot.slane %v1307_v15, 9  ;;  %v1452_v25 = vmax.f32 %v1305_v4, %v3438_v16  ;;  %v5830_v26 = vrot.slane %v1528_v62, %v5758_v52 }
 0x131   :  { %v1451_v27 = vmax.f32 %v1306_v10, %v3437_v60  ;;  %v1509_v28 = vadd.f32 %v5735_v39, %v1450_v20  ;;  %v1446_v9 = vmax.f32 %v1281_v6, %v3432_v21  ;;  %v5834_v29 = vrot.slane %v1524_v7, %v5758_v52 }
 0x132   :  { %v5838_v31 = vsel %vm1671_vm4, %v5819_v8, %v1868_v0  ;;  %v1453_v11 = vmax.f32 %v1307_v15, %v3439_v24  ;;  %v1511_v30 = vadd.f32 %v5742_v41, %v1452_v25  ;;  %v5842_v34 = vcombine.high %v1288_v17, %v1288_v17 }
 0x133   :  { %v1510_v32 = vadd.f32 %v5749_v46, %v1451_v27  ;;  %v3433_v35 = vrot.slane %v1289_v19, 9  ;;  %v1505_v36 = vadd.f32 %v5738_v40, %v1446_v9  ;;  %v3434_v44 = vrot.slane %v1288_v17, 9 }
 0x134   :  { %v1512_v37 = vadd.f32 %v5753_v50, %v1453_v11  ;;  %v1535_v42 = vmax.f32 %v1511_v30, 0.0  ;;  %v1325_v45 = vcombine.high %v1233_v22, %v1233_v22  ;;  %v1533_v47 = vmax.f32 %v1509_v28, 0.0 }
 0x135   :  { %v1534_v49 = vmax.f32 %v1510_v32, 0.0  ;;  %v1529_v53 = vmax.f32 %v1505_v36, 0.0  ;;  %v1332_v57 = vrot.slane %v1233_v22, %v5732_v38  ;;  %v1232_v0 = vmax.f32 %v5727_v33, %v5767_v18 }
 0x136   :  { %v1536_v59 = vmax.f32 %v1512_v37, 0.0  ;;  %v5848_v62 = vrot.slane %v1535_v42, %v5758_v52  ;;  %v5851_v63 = vrot.slane %v1325_v45, %v5732_v38  ;;  %v3435_v4 = vrot.slane %v5842_v34, 9 }
 0x137   :  { %v1642_v2 = vrot.slane %v1534_v49, %v5758_v52  ;;  %v1340_v5 = vcombine.high %v1332_v57, %v1332_v57  ;;  %v3444_v6 = vrot.slane %v1332_v57, 9  ;;  %v5860_v10 = vmax.f32 %v1289_v19, %v3433_v35 }
 0x138   :  { %v5858_v7 = vrot.slane %v1536_v59, %v5758_v52  ;;  %v3446_v14 = vrot.slane %v5851_v63, 9  ;;  %v1308_v15 = vcombine.high %v1232_v0, %v1232_v0  ;;  %v1872_v33 = vrot.slane %v1533_v47, %v5758_v52 }
 0x139   :  { %v5864_v18 = vmax.f32 %v1288_v17, %v3434_v44  ;;  %v3445_v16 = vrot.slane %v1340_v5, 9  ;;  %v1458_v60 = vmax.f32 %v1332_v57, %v3444_v6  ;;  %v1685_v20 = vsel %vm1671_vm4, %v5848_v62, %v1642_v2 }
 0x13a   :  { %v1460_v21 = vmax.f32 %v5851_v63, %v3446_v14  ;;  %v1315_v19 = vrot.slane %v1232_v0, %v5732_v38  ;;  %v5871_v22 = vrot.slane %v1529_v53, %v5758_v52  ;;  %v1322_v17 = vrot.slane %v1308_v15, %v5732_v38 }
 0x13b   :  { %v1459_v24 = vmax.f32 %v1340_v5, %v3445_v16  ;;  %v1517_v25 = vadd.f32 %v5735_v39, %v1458_v60  ;;  %v1672_v27 = vsel %vm1671_vm4, %v5827_v1, %v5819_v8  ;;  %v1880_v28 = vsel %vm1671_vm4, %v1642_v2, %v1872_v33 }
 0x13c   :  { %v2074_v9 = vsel %vm1671_vm4, %v5858_v7, %v5848_v62  ;;  %v1323_v11 = vcombine.high %v1315_v19, %v1315_v19  ;;  %v3440_v30 = vrot.slane %v1315_v19, 9  ;;  %v1324_v36 = vcombine.high %v1322_v17, %v1322_v17 }
 0x13d   :  { %v1518_v32 = vadd.f32 %v5749_v46, %v1459_v24  ;;  %v1541_v35 = vmax.f32 %v1517_v25, 0.0  ;;  %v3442_v37 = vrot.slane %v1322_v17, 9  ;;  %v5884_v39 = vadd.f32 %v5742_v41, %v1460_v21 }
 0x13e   :  { %v3441_v42 = vrot.slane %v1323_v11, 9  ;;  %v1454_v44 = vmax.f32 %v1315_v19, %v3440_v30  ;;  %v1674_v8 = vsel %vm1673_vm5, %v5834_v29, %v1672_v27  ;;  %v3443_v49 = vrot.slane %v1324_v36, 9 }
 0x13f   :  { %v1542_v45 = vmax.f32 %v1518_v32, 0.0  ;;  %v5889_v47 = vrot.slane %v1541_v35, %v5758_v52  ;;  %v1456_v53 = vmax.f32 %v1322_v17, %v3442_v37  ;;  %v1676_v59 = vsel %vm1675_vm6, %v5807_v58, %v1674_v8 }
 0x140   :  { %v1455_v57 = vmax.f32 %v1323_v11, %v3441_v42  ;;  %v1513_v46 = vadd.f32 %v5738_v40, %v1454_v44  ;;  %v1686_v41 = vsel %vm1673_vm5, %v5858_v7, %v1685_v20  ;;  %v1457_v0 = vmax.f32 %v1324_v36, %v3443_v49 }
 0x141   :  { %v1515_v2 = vadd.f32 %v5746_v43, %v1456_v53  ;;  %v1678_v5 = vsel %vm1677_vm8, %v5814_v3, %v1676_v59  ;;  %v1874_v6 = vsel %vm1673_vm5, %v5827_v1, %v5838_v31  ;;  %v1881_v30 = vsel %vm1673_vm5, %v5848_v62, %v1880_v28 }
 0x142   :  { %v1514_v14 = vadd.f32 %v5756_v51, %v1455_v57  ;;  %v1537_v15 = vmax.f32 %v1513_v46, 0.0  ;;  %v1680_v40 = vsel %vm1679_vm7, %v5824_v23, %v1678_v5  ;;  %v1875_v33 = vsel %vm1675_vm6, %v5834_v29, %v1874_v6 }
 0x143   :  { %v1516_v16 = vadd.f32 %v5762_v55, %v1457_v0  ;;  %v1539_v60 = vmax.f32 %v1515_v2, 0.0  ;;  %v1682_v20 = vsel %vm1681_vm9, %v5830_v26, %v1680_v40  ;;  %v1876_v21 = vsel %vm1677_vm8, %v5807_v58, %v1875_v33  ;;  %v1551_v33 = vld [vmem:[%s6710_s4 + $0x30] sm:$0xff] }
 0x144   :  { %v1538_v19 = vmax.f32 %v1514_v14, 0.0  ;;  %v5913_v31 = vrot.slane %v1537_v15, %v5758_v52  ;;  %v1684_v24 = vsel %vm1683_vm10, %v5871_v22, %v1682_v20  ;;  %v1877_v25 = vsel %vm1679_vm7, %v5814_v3, %v1876_v21 }
 0x145   :  { %v1540_v17 = vmax.f32 %v1516_v16, 0.0  ;;  %v5920_v27 = vrot.slane %v1539_v60, %v5758_v52  ;;  %4165 = vmatprep.mubr.msk.f32.mxu0 %vm1692_vm11, %v1684_v24  ;;  %4198 = vmatprep.mubr.msk.f32.mxu1 %vm1692_vm11, %v1684_v24  ;;  %v1878_v11 = vsel %vm1681_vm9, %v5824_v23, %v1877_v25  ;;  %v1882_v37 = vsel %vm1675_vm6, %v5858_v7, %v1881_v30  ;;  %v1552_v16 = vld [vmem:[%s6710_s4 + $0x38] sm:$0xff]  ;;  %v1553_v30 = vld [vmem:[%s6710_s4 + $0x40] sm:$0xff] }
 0x146   :  { %v5929_v32 = vrot.slane %v1538_v19, %v5758_v52  ;;  %v1687_v35 = vsel %vm1675_vm6, %v5913_v31, %v1686_v41  ;;  %v1879_v36 = vsel %vm1683_vm10, %v5830_v26, %v1878_v11  ;;  %v1883_v44 = vsel %vm1677_vm8, %v5913_v31, %v1882_v37 }
 0x147   :  { %v5938_v42 = vrot.slane %v1540_v17, %v5758_v52  ;;  %v1506_v62 = vadd.f32 %v5756_v51, %v5860_v10  ;;  %v2067_v28 = vsel %vm1671_vm4, %v5834_v29, %v5827_v1  ;;  %v5954_v57 = vrot.slane %v1542_v45, %v5758_v52 }
 0x148   :  { %v1688_v8 = vsel %vm1677_vm8, %v5929_v32, %v1687_v35  ;;  %v1884_v49 = vsel %vm1679_vm7, %v5929_v32, %v1883_v44  ;;  %v2068_v53 = vsel %vm1673_vm5, %v5807_v58, %v2067_v28  ;;  %v2075_v0 = vsel %vm1673_vm5, %v5913_v31, %v2074_v9  ;;  %v1569_v44 = vld [vmem:[%s6711_s5 + $0x48] sm:$0xff] }
 0x149   :  { %v1689_v46 = vsel %vm1679_vm7, %v5920_v27, %v1688_v8  ;;  %v1885_v51 = vsel %vm1681_vm9, %v5920_v27, %v1884_v49  ;;  %v1530_v10 = vmax.f32 %v1506_v62, 0.0  ;;  %v2069_v1 = vsel %vm1675_vm6, %v5814_v3, %v2068_v53 }
 0x14a   :  { %v1690_v59 = vsel %vm1681_vm9, %v5938_v42, %v1689_v46  ;;  %v5966_v41 = vsel %vm1683_vm10, %v5938_v42, %v1885_v51  ;;  %v2070_v45 = vsel %vm1677_vm8, %v5824_v23, %v2069_v1  ;;  %v2076_v14 = vsel %vm1675_vm6, %v5929_v32, %v2075_v0 }
 0x14b   :  { %v1691_v2 = vsel %vm1683_vm10, %v5889_v47, %v1690_v59  ;;  %v5975_v5 = vrot.slane %v1530_v10, %v5758_v52  ;;  %v2071_v6 = vsel %vm1679_vm7, %v5830_v26, %v2070_v45  ;;  %v2077_v9 = vsel %vm1677_vm8, %v5920_v27, %v2076_v14 }
 0x14c   :  { %4166 = vmatmul.mubr.msk.f32.vlgmr.msra.gmra.mrb[6].mxu0 %vm1692_vm11, %v1691_v2  ;;  %4199 = vmatmul.mubr.msk.f32.vlgmr.msra.gmra.mrb[12].mxu1 %vm1692_vm11, %v1691_v2  ;;  %v2072_v15 = vsel %vm1681_vm9, %v5871_v22, %v2071_v6  ;;  %v1507_v40 = vadd.f32 %v5746_v43, %v5864_v18  ;;  %v2078_v20 = vsel %vm1679_vm7, %v5938_v42, %v2077_v9  ;;  %v1555_v2 = vld [vmem:[%s6710_s4 + $0x50] sm:$0xff]  ;;  %v1571_v6 = vld [vmem:[%s6711_s5 + $0x58] sm:$0xff] }
 0x14d   :  { %4751 = vmatpush3.bf16.msra.mxu0 %v5719_v12  ;;  %4779 = vmatpush3.bf16.msra.mxu1 %v5721_v13  ;;  %v5999_v60 = vsel %vm1683_vm10, %v5975_v5, %v2072_v15  ;;  %v2281_v12 = vsel %vm1671_vm4, %v5807_v58, %v5834_v29  ;;  %v1341_v13 = vcombine.high %v5851_v63, %v5851_v63  ;;  %v1566_v29 = vld [vmem:[%s6711_s5 + $0x30] sm:$0xff]  ;;  %v1567_v63 = vld [vmem:[%s6711_s5 + $0x38] sm:$0xff] }
 0x14e   :  { %4231 = vmatprep.mubr.msk.f32.mxu0 %vm1692_vm11, %v1879_v36  ;;  %4264 = vmatprep.mubr.msk.f32.mxu1 %vm1692_vm11, %v1879_v36  ;;  %v2079_v43 = vsel %vm1681_vm9, %v5889_v47, %v2078_v20  ;;  %v1531_v18 = vmax.f32 %v1507_v40, 0.0  ;;  %v2282_v21 = vsel %vm1673_vm5, %v5814_v3, %v2281_v12  ;;  %v1449_v19 = vmax.f32 %v5842_v34, %v3435_v4  ;;  %v1558_v20 = vld [vmem:[%s6710_s4 + $0x68] sm:$0xff] }
 0x14f   :  { %4753 = vmatprep.subr.bf16.mxu0 %v5799_v48  ;;  %4781 = vmatprep.subr.bf16.mxu1 %v5802_v54  ;;  %v6027_v24 = vsel %vm1683_vm10, %v5954_v57, %v2079_v43  ;;  %v2283_v25 = vsel %vm1675_vm6, %v5824_v23, %v2282_v21  ;;  %v1543_v34 = vmax.f32 %v5884_v39, 0.0  ;;  %v4760_v4 = vpack.c.bf16 %v1552_v16, %v1551_v33  ;;  %v1554_v39 = vld [vmem:[%s6710_s4 + $0x48] sm:$0xff]  ;;  %v1557_v16 = vld [vmem:[%s6710_s4 + $0x60] sm:$0xff] }
 0x150   :  { %v2284_v17 = vsel %vm1677_vm8, %v5830_v26, %v2283_v25  ;;  %v2288_v11 = vsel %vm1671_vm4, %v5913_v31, %v5858_v7  ;;  %v2276_v35 = vrot.slane %v1531_v18, %v5758_v52  ;;  %v3447_v37 = vrot.slane %v1341_v13, 9  ;;  %v1573_v43 = vld [vmem:[%s6711_s5 + $0x68] sm:$0xff] }
 0x151   :  { %4755 = vmatpush3.bf16.msra.mxu0 %v5799_v48  ;;  %4783 = vmatpush3.bf16.msra.mxu1 %v5802_v54  ;;  %v2285_v36 = vsel %vm1679_vm7, %v5871_v22, %v2284_v17  ;;  %v2289_v7 = vsel %vm1673_vm5, %v5929_v32, %v2288_v11  ;;  %v4788_v48 = vpack.c.bf16 %v1567_v63, %v1566_v29  ;;  %v1568_v54 = vld [vmem:[%s6711_s5 + $0x40] sm:$0xff]  ;;  %v3505_v17 = vld [vmem:[%s6711_s5 + $0xf8] sm:$0xff] }
 0x152   :  { %4757 = vmatprep.subr.bf16.mxu0 %v5804_v56  ;;  %4785 = vmatprep.subr.bf16.mxu1 %v5809_v61  ;;  %v2286_v62 = vsel %vm1681_vm9, %v5975_v5, %v2285_v36  ;;  %v2290_v28 = vsel %vm1675_vm6, %v5920_v27, %v2289_v7  ;;  %v1508_v53 = vadd.f32 %v5762_v55, %v1449_v19  ;;  %v3489_v11 = vld [vmem:[%s6710_s4 + $0x100] sm:$0xff]  ;;  %v3507_v7 = vld [vmem:[%s6711_s5 + $0x108] sm:$0xff] }
 0x153   :  { %v6063_v8 = vsel %vm1683_vm10, %v2276_v35, %v2286_v62  ;;  %v2291_v49 = vsel %vm1677_vm8, %v5938_v42, %v2290_v28  ;;  %v2495_v46 = vsel %vm1671_vm4, %v5814_v3, %v5807_v58  ;;  %v4764_v51 = vpack.c.bf16 %v1554_v39, %v1553_v30  ;;  %v3506_v36 = vld [vmem:[%s6711_s5 + $0x100] sm:$0xff]  ;;  %v3508_v62 = vld [vmem:[%s6711_s5 + $0x110] sm:$0xff] }
 0x154   :  { %v2280_v10 = vrot.slane %v1543_v34, %v5758_v52  ;;  %v2292_v1 = vsel %vm1679_vm7, %v5889_v47, %v2291_v49  ;;  %v2496_v59 = vsel %vm1673_vm5, %v5824_v23, %v2495_v46  ;;  %v4792_v45 = vpack.c.bf16 %v1569_v44, %v1568_v54  ;;  %v3488_v34 = vld [vmem:[%s6710_s4 + $0xf8] sm:$0xff]  ;;  %v3491_v54 = vld [vmem:[%s6710_s4 + $0x110] sm:$0xff]  ;;  %v3494_v46 = vld [vmem:[%s6710_s4 + $0x128] sm:$0xff] }
 0x155   :  { %4759 = vmatpush3.bf16.msra.mxu0 %v5804_v56  ;;  %4787 = vmatpush3.bf16.msra.mxu1 %v5809_v61  ;;  %v2293_v55 = vsel %vm1681_vm9, %v5954_v57, %v2292_v1  ;;  %v1532_v0 = vmax.f32 %v1508_v53, 0.0  ;;  %v2497_v58 = vsel %vm1675_vm6, %v5830_v26, %v2496_v59  ;;  %v1461_v3 = vmax.f32 %v1341_v13, %v3447_v37  ;;  %v1556_v56 = vld [vmem:[%s6710_s4 + $0x58] sm:$0xff]  ;;  %v1570_v26 = vld [vmem:[%s6711_s5 + $0x50] sm:$0xff]  ;;  %v1572_v13 = vld [vmem:[%s6711_s5 + $0x60] sm:$0xff] }
 0x156   :  { %4761 = vmatprep.subr.bf16.mxu0 %v4760_v4  ;;  %4789 = vmatprep.subr.bf16.mxu1 %v4788_v48  ;;  %v6089_v61 = vsel %vm1683_vm10, %v2280_v10, %v2293_v55  ;;  %v2498_v23 = vsel %vm1677_vm8, %v5871_v22, %v2497_v58  ;;  %v4768_v40 = vpack.c.bf16 %v1556_v56, %v1555_v2  ;;  %v3492_v44 = vld [vmem:[%s6710_s4 + $0x118] sm:$0xff]  ;;  %v3493_v53 = vld [vmem:[%s6710_s4 + $0x120] sm:$0xff]  ;;  %v3495_v59 = vld [vmem:[%s6710_s4 + $0x130] sm:$0xff] }
 0x157   :  { %v2490_v14 = vrot.slane %v1532_v0, %v5758_v52  ;;  %v2499_v15 = vsel %vm1679_vm7, %v5975_v5, %v2498_v23  ;;  %v4796_v33 = vpack.c.bf16 %v1571_v6, %v1570_v26  ;;  %v1520_v5 = vadd.f32 %v5753_v50, %v1461_v3  ;;  %v3512_v55 = vld [vmem:[%s6711_s5 + $0x130] sm:$0xff]  ;;  %v3513_v0 = vld [vmem:[%s6711_s5 + $0x138] sm:$0xff]  ;;  %v3497_v2 = vld [vmem:[%s6710_s4 + $0x140] sm:$0xff] }
 0x158   :  { %v2500_v9 = vsel %vm1681_vm9, %v2276_v35, %v2499_v15  ;;  %v2502_v12 = vsel %vm1671_vm4, %v5929_v32, %v5913_v31  ;;  %v4772_v50 = vpack.c.bf16 %v1558_v20, %v1557_v16  ;;  %v4800_v32 = vpack.c.bf16 %v1573_v43, %v1572_v13  ;;  %v3490_v35 = vld [vmem:[%s6710_s4 + $0x108] sm:$0xff]  ;;  %v3514_v23 = vld [vmem:[%s6711_s5 + $0x140] sm:$0xff]  ;;  %v3499_v15 = vld [vmem:[%s6710_s4 + $0x150] sm:$0xff] }
 0x159   :  { %4763 = vmatpush3.bf16.msra.mxu0 %v4760_v4  ;;  %4791 = vmatpush3.bf16.msra.mxu1 %v4788_v48  ;;  %v6104_v22 = vsel %vm1683_vm10, %v2490_v14, %v2500_v9  ;;  %v2503_v18 = vsel %vm1673_vm5, %v5920_v27, %v2502_v12  ;;  %v1544_v21 = vmax.f32 %v1520_v5, 0.0  ;;  %v3504_v4 = vld [vmem:[%s6711_s5 + $0xf0] sm:$0xff]  ;;  %v4808_v37 = vpack.c.bf16 %v3490_v35, %v3489_v11  ;;  %v3498_v56 = vld [vmem:[%s6710_s4 + $0x148] sm:$0xff]  ;;  %v3500_v9 = vld [vmem:[%s6710_s4 + $0x158] sm:$0xff] }
 0x15a   :  { %4765 = vmatprep.subr.bf16.mxu0 %v4764_v51  ;;  %4793 = vmatprep.subr.bf16.mxu1 %v4792_v45  ;;  %v2504_v19 = vsel %vm1675_vm6, %v5938_v42, %v2503_v18  ;;  %v1574_v42 = vld [vmem:[%s6711_s5 + $0x70] sm:$0xff]  ;;  %v4832_v39 = vpack.c.bf16 %v3505_v17, %v3504_v4  ;;  %v4836_v48 = vpack.c.bf16 %v3507_v7, %v3506_v36  ;;  %v3515_v26 = vld [vmem:[%s6711_s5 + $0x148] sm:$0xff]  ;;  %v3501_v5 = vld [vmem:[%s6710_s4 + $0x160] sm:$0xff] }
 0x15b   :  { %v2505_v31 = vsel %vm1677_vm8, %v5889_v47, %v2504_v19  ;;  %v2494_v29 = vrot.slane %v1544_v21, %v5758_v52  ;;  %v1559_v47 = vld [vmem:[%s6710_s4 + $0x70] sm:$0xff]  ;;  %v4812_v28 = vpack.c.bf16 %v3492_v44, %v3491_v54  ;;  %v4848_v3 = vpack.c.bf16 %v3513_v0, %v3512_v55  ;;  %v3518_v12 = vld [vmem:[%s6711_s5 + $0x160] sm:$0xff]  ;;  %v3521_v13 = vld [vmem:[%s6710_s4 + $0x168] sm:$0xff] }
 0x15c   :  { %v2506_v63 = vsel %vm1679_vm7, %v5954_v57, %v2505_v31  ;;  %v3487_v57 = vld [vmem:[%s6710_s4 + $0xf0] sm:$0xff]  ;;  %v4824_v6 = vpack.c.bf16 %v3498_v56, %v3497_v2  ;;  %v4852_v14 = vpack.c.bf16 %v3515_v26, %v3514_v23  ;;  %v4828_v16 = vpack.c.bf16 %v3500_v9, %v3499_v15  ;;  %v3538_v18 = vld [vmem:[%s6711_s5 + $0x168] sm:$0xff]  ;;  %v3524_v31 = vld [vmem:[%s6710_s4 + $0x180] sm:$0xff] }
 0x15d   :  { %4767 = vmatpush3.bf16.msra.mxu0 %v4764_v51  ;;  %4795 = vmatpush3.bf16.msra.mxu1 %v4792_v45  ;;  %v2507_v27 = vsel %vm1681_vm9, %v2280_v10, %v2506_v63  ;;  %v4804_v30 = vpack.c.bf16 %v3488_v34, %v3487_v57  ;;  %v3510_v51 = vld [vmem:[%s6711_s5 + $0x120] sm:$0xff]  ;;  %v4816_v10 = vpack.c.bf16 %v3494_v46, %v3493_v53  ;;  %v3496_v45 = vld [vmem:[%s6710_s4 + $0x138] sm:$0xff]  ;;  %v3522_v43 = vld [vmem:[%s6710_s4 + $0x170] sm:$0xff] }
 0x15e   :  { %4769 = vmatprep.subr.bf16.mxu0 %v4768_v40  ;;  %4797 = vmatprep.subr.bf16.mxu1 %v4796_v33  ;;  %v6133_v25 = vsel %vm1683_vm10, %v2494_v29, %v2507_v27  ;;  %v4820_v58 = vpack.c.bf16 %v3496_v45, %v3495_v59  ;;  %v3539_v21 = vld [vmem:[%s6711_s5 + $0x170] sm:$0xff]  ;;  %v4860_v19 = vpack.c.bf16 %v3522_v43, %v3521_v13  ;;  %v3540_v29 = vld [vmem:[%s6711_s5 + $0x178] sm:$0xff]  ;;  %v3541_v63 = vld [vmem:[%s6711_s5 + $0x180] sm:$0xff] }
 0x15f   :  { %v4892_v57 = vpack.c.bf16 %v3541_v63, %v3540_v29  ;;  %v3542_v34 = vld [vmem:[%s6711_s5 + $0x188] sm:$0xff]  ;;  %v3543_v4 = vld [vmem:[%s6711_s5 + $0x190] sm:$0xff]  ;;  %v3527_v11 = vld [vmem:[%s6710_s4 + $0x198] sm:$0xff] }
 0x160   :  { %v3545_v35 = vld [vmem:[%s6711_s5 + $0x1a0] sm:$0xff]  ;;  %v3529_v7 = vld [vmem:[%s6710_s4 + $0x1a8] sm:$0xff]  ;;  %v3547_v54 = vld [vmem:[%s6711_s5 + $0x1b0] sm:$0xff] }
 0x161   :  { %4771 = vmatpush3.bf16.msra.mxu0 %v4768_v40  ;;  %4799 = vmatpush3.bf16.msra.mxu1 %v4796_v33  ;;  %v3516_v40 = vld [vmem:[%s6711_s5 + $0x150] sm:$0xff]  ;;  %v3517_v33 = vld [vmem:[%s6711_s5 + $0x158] sm:$0xff]  ;;  %v3549_v53 = vld [vmem:[%s6711_s5 + $0x1c0] sm:$0xff] }
 0x162   :  { %4773 = vmatprep.subr.bf16.mxu0 %v4772_v50  ;;  %4801 = vmatprep.subr.bf16.mxu1 %v4800_v32  ;;  %v4856_v20 = vpack.c.bf16 %v3517_v33, %v3516_v40  ;;  %v3551_v59 = vld [vmem:[%s6711_s5 + $0x1d0] sm:$0xff]  ;;  %v3535_v0 = vld [vmem:[%s6710_s4 + $0x1d8] sm:$0xff]  ;;  %v3556_v2 = vld [vmem:[%s6710_s4 + $0x1e8] sm:$0xff] }
 0x163   :  { %v3572_v56 = vld [vmem:[%s6711_s5 + $0x1e0] sm:$0xff]  ;;  %v3573_v23 = vld [vmem:[%s6711_s5 + $0x1e8] sm:$0xff]  ;;  %v3574_v9 = vld [vmem:[%s6711_s5 + $0x1f0] sm:$0xff] }
 0x164   :  { %v4944_v15 = vpack.c.bf16 %v3573_v23, %v3572_v56  ;;  %v3575_v40 = vld [vmem:[%s6711_s5 + $0x1f8] sm:$0xff]  ;;  %v3577_v13 = vld [vmem:[%s6711_s5 + $0x208] sm:$0xff]  ;;  %v3580_v63 = vld [vmem:[%s6711_s5 + $0x220] sm:$0xff] }
 0x165   :  { %4775 = vmatpush3.bf16.msra.mxu0 %v4772_v50  ;;  %4803 = vmatpush3.bf16.msra.mxu1 %v4800_v32  ;;  %v3523_v50 = vld [vmem:[%s6710_s4 + $0x178] sm:$0xff]  ;;  %v4888_v32 = vpack.c.bf16 %v3539_v21, %v3538_v18  ;;  %v3561_v18 = vld [vmem:[%s6710_s4 + $0x210] sm:$0xff]  ;;  %v3564_v29 = vld [vmem:[%s6710_s4 + $0x228] sm:$0xff] }
 0x166   :  { %4229 = vmatprep.subr.mxu0 %v1559_v47  ;;  %4262 = vmatprep.subr.mxu1 %v1574_v42  ;;  %v4864_v27 = vpack.c.bf16 %v3524_v31, %v3523_v50  ;;  %v3562_v21 = vld [vmem:[%s6710_s4 + $0x218] sm:$0xff]  ;;  %v2818_v56 = vld [vmem:[%s6713_s7 + $0x30] sm:$0xff] }
 0x167   :  { %v3579_v50 = vld [vmem:[%s6711_s5 + $0x218] sm:$0xff] }
 0x168   :  { %v2819_v23 = vld [vmem:[%s6713_s7 + $0x38] sm:$0xff] }
 0x169   :  { %4230 = vmatpush3.msra.mxu0 %v1559_v47  ;;  %4263 = vmatpush3.msra.mxu1 %v1574_v42  ;;  %v3525_v47 = vld [vmem:[%s6710_s4 + $0x188] sm:$0xff]  ;;  %v3526_v42 = vld [vmem:[%s6710_s4 + $0x190] sm:$0xff] }
 0x16a   :  { %4232 = vmatmul.mubr.msk.f32.vlgmr.msra.gmra.mrb[6].mxu0 %vm1692_vm11, %v5966_v41  ;;  %4265 = vmatmul.mubr.msk.f32.vlgmr.msra.gmra.mrb[12].mxu1 %vm1692_vm11, %v5966_v41  ;;  %v3509_v41 = vld [vmem:[%s6711_s5 + $0x118] sm:$0xff]  ;;  %v4868_v17 = vpack.c.bf16 %v3526_v42, %v3525_v47 }
 0x16b   :  { %4805 = vmatprep.subr.bf16.mxu0 %v4804_v30  ;;  %4833 = vmatprep.subr.bf16.mxu1 %v4832_v39  ;;  %v4840_v49 = vpack.c.bf16 %v3509_v41, %v3508_v62  ;;  %v3531_v41 = vld [vmem:[%s6710_s4 + $0x1b8] sm:$0xff] }
 0x16c   :  { %4807 = vmatpush3.bf16.msra.mxu0 %v4804_v30  ;;  %4297 = vmatprep.mubr.msk.f32.mxu0 %vm1692_vm11, %v5999_v60  ;;  %v3528_v30 = vld [vmem:[%s6710_s4 + $0x1a0] sm:$0xff] }
 0x16d   :  { %4835 = vmatpush3.bf16.msra.mxu1 %v4832_v39  ;;  %4330 = vmatprep.mubr.msk.f32.mxu1 %vm1692_vm11, %v5999_v60  ;;  %v3511_v60 = vld [vmem:[%s6711_s5 + $0x128] sm:$0xff]  ;;  %v3544_v39 = vld [vmem:[%s6711_s5 + $0x198] sm:$0xff] }
 0x16e   :  { %4809 = vmatprep.subr.bf16.mxu0 %v4808_v37  ;;  %4837 = vmatprep.subr.bf16.mxu1 %v4836_v48  ;;  %v4844_v1 = vpack.c.bf16 %v3511_v60, %v3510_v51  ;;  %v4900_v36 = vpack.c.bf16 %v3545_v35, %v3544_v39  ;;  %v3533_v60 = vld [vmem:[%s6710_s4 + $0x1c8] sm:$0xff]  ;;  %v3584_v35 = vld [vmem:[%s6711_s5 + $0x240] sm:$0xff] }
 0x16f   :  { %v3568_v39 = vld [vmem:[%s6710_s4 + $0x248] sm:$0xff] }
 0x170   :  { %4811 = vmatpush3.bf16.msra.mxu0 %v4808_v37  ;;  %v3530_v37 = vld [vmem:[%s6710_s4 + $0x1b0] sm:$0xff] }
 0x171   :  { %4839 = vmatpush3.bf16.msra.mxu1 %v4836_v48  ;;  %4813 = vmatprep.subr.bf16.mxu0 %v4812_v28  ;;  %v3546_v48 = vld [vmem:[%s6711_s5 + $0x1a8] sm:$0xff]  ;;  %v4876_v44 = vpack.c.bf16 %v3530_v37, %v3529_v7  ;;  %v3569_v37 = vld [vmem:[%s6710_s4 + $0x250] sm:$0xff] }
 0x172   :  { %4841 = vmatprep.subr.bf16.mxu1 %v4840_v49  ;;  %v4904_v62 = vpack.c.bf16 %v3547_v54, %v3546_v48  ;;  %v3586_v48 = vld [vmem:[%s6711_s5 + $0x250] sm:$0xff]  ;;  %v2812_v54 = vld [vmem:[%s6713_s7] sm:$0xff] }
 0x174   :  { %4815 = vmatpush3.bf16.msra.mxu0 %v4812_v28  ;;  %v3532_v28 = vld [vmem:[%s6710_s4 + $0x1c0] sm:$0xff] }
 0x175   :  { %4843 = vmatpush3.bf16.msra.mxu1 %v4840_v49  ;;  %4817 = vmatprep.subr.bf16.mxu0 %v4816_v10  ;;  %v3548_v49 = vld [vmem:[%s6711_s5 + $0x1b8] sm:$0xff]  ;;  %v4880_v46 = vpack.c.bf16 %v3532_v28, %v3531_v41 }
 0x176   :  { %4845 = vmatprep.subr.bf16.mxu1 %v4844_v1  ;;  %v4908_v51 = vpack.c.bf16 %v3549_v53, %v3548_v49  ;;  %v3599_v41 = vld [vmem:[%s6713_s7 + $0x58] sm:$0xff]  ;;  %v5177_v53 = vmov 0.0|0.0  }
 0x178   :  { %4819 = vmatpush3.bf16.msra.mxu0 %v4816_v10  ;;  %v3534_v10 = vld [vmem:[%s6710_s4 + $0x1d0] sm:$0xff] }
 0x179   :  { %4847 = vmatpush3.bf16.msra.mxu1 %v4844_v1  ;;  %4821 = vmatprep.subr.bf16.mxu0 %v4820_v58  ;;  %v3550_v1 = vld [vmem:[%s6711_s5 + $0x1c8] sm:$0xff]  ;;  %v4884_v45 = vpack.c.bf16 %v3534_v10, %v3533_v60 }
 0x17a   :  { %4849 = vmatprep.subr.bf16.mxu1 %v4848_v3  ;;  %v4912_v55 = vpack.c.bf16 %v3551_v59, %v3550_v1  ;;  %v3601_v10 = vld [vmem:[%s6713_s7 + $0x68] sm:$0xff]  ;;  %v2816_v1 = vld [vmem:[%s6713_s7 + $0x20] sm:$0xff] }
 0x17b   :  { %v2817_v59 = vld [vmem:[%s6713_s7 + $0x28] sm:$0xff] }
 0x17c   :  { %4823 = vmatpush3.bf16.msra.mxu0 %v4820_v58  ;;  %v3552_v58 = vld [vmem:[%s6711_s5 + $0x1d8] sm:$0xff] }
 0x17d   :  { %4851 = vmatpush3.bf16.msra.mxu1 %v4848_v3  ;;  %4825 = vmatprep.subr.bf16.mxu0 %v4824_v6  ;;  %v3555_v3 = vld [vmem:[%s6710_s4 + $0x1e0] sm:$0xff] }
 0x17e   :  { %4853 = vmatprep.subr.bf16.mxu1 %v4852_v14  ;;  %v4916_v26 = vpack.c.bf16 %v3556_v2, %v3555_v3  ;;  %v4994_v3 = vpack.c.bf16 %v2817_v59, %v2816_v1 }
 0x180   :  { %4827 = vmatpush3.bf16.msra.mxu0 %v4824_v6  ;;  %v3557_v6 = vld [vmem:[%s6710_s4 + $0x1f0] sm:$0xff] }
 0x181   :  { %4855 = vmatpush3.bf16.msra.mxu1 %v4852_v14  ;;  %4829 = vmatprep.subr.bf16.mxu0 %v4828_v16  ;;  %v3558_v14 = vld [vmem:[%s6710_s4 + $0x1f8] sm:$0xff] }
 0x182   :  { %4857 = vmatprep.subr.bf16.mxu1 %v4856_v20  ;;  %v4920_v33 = vpack.c.bf16 %v3558_v14, %v3557_v6  ;;  %v3605_v6 = vld [vmem:[%s6713_s7 + $0x88] sm:$0xff]  ;;  %v4997_v14 = vpack.c.bf16 %v2819_v23, %v2818_v56 }
 0x184   :  { %4831 = vmatpush3.bf16.msra.mxu0 %v4828_v16  ;;  %v3559_v16 = vld [vmem:[%s6710_s4 + $0x200] sm:$0xff] }
 0x185   :  { %4859 = vmatpush3.bf16.msra.mxu1 %v4856_v20  ;;  %4295 = vmatprep.subr.mxu0 %v3501_v5  ;;  %v3560_v20 = vld [vmem:[%s6710_s4 + $0x208] sm:$0xff] }
 0x186   :  { %4328 = vmatprep.subr.mxu1 %v3518_v12  ;;  %v4924_v43 = vpack.c.bf16 %v3560_v20, %v3559_v16  ;;  %v3607_v16 = vld [vmem:[%s6713_s7 + $0x98] sm:$0xff] }
 0x188   :  { %4296 = vmatpush3.msra.mxu0 %v3501_v5  ;;  %v4948_v5 = vpack.c.bf16 %v3575_v40, %v3574_v9  ;;  %v2820_v9 = vld [vmem:[%s6713_s7 + $0x40] sm:$0xff]  ;;  %v2821_v40 = vld [vmem:[%s6713_s7 + $0x48] sm:$0xff] }
 0x189   :  { %4329 = vmatpush3.msra.mxu1 %v3518_v12  ;;  %4298 = vmatmul.mubr.msk.f32.vlgmr.msra.gmra.mrb[6].mxu0 %vm1692_vm11, %v6027_v24  ;;  %v3576_v12 = vld [vmem:[%s6711_s5 + $0x200] sm:$0xff]  ;;  %v5000_v20 = vpack.c.bf16 %v2821_v40, %v2820_v9 }
 0x18a   :  { %4331 = vmatmul.mubr.msk.f32.vlgmr.msra.gmra.mrb[12].mxu1 %vm1692_vm11, %v6027_v24  ;;  %4861 = vmatprep.subr.bf16.mxu0 %v4860_v19  ;;  %v4896_v24 = vpack.c.bf16 %v3543_v4, %v3542_v34  ;;  %v3566_v34 = vld [vmem:[%s6710_s4 + $0x238] sm:$0xff]  ;;  %v3582_v4 = vld [vmem:[%s6711_s5 + $0x230] sm:$0xff] }
 0x18b   :  { %4889 = vmatprep.subr.bf16.mxu1 %v4888_v32  ;;  %4863 = vmatpush3.bf16.msra.mxu0 %v4860_v19  ;;  %v3578_v19 = vld [vmem:[%s6711_s5 + $0x210] sm:$0xff] }
 0x18c   :  { %4363 = vmatprep.mubr.msk.f32.mxu0 %vm1692_vm11, %v6063_v8  ;;  %4891 = vmatpush3.bf16.msra.mxu1 %v4888_v32  ;;  %v4956_v31 = vpack.c.bf16 %v3579_v50, %v3578_v19  ;;  %v3563_v32 = vld [vmem:[%s6710_s4 + $0x220] sm:$0xff] }
 0x18d   :  { %4396 = vmatprep.mubr.msk.f32.mxu1 %vm1692_vm11, %v6063_v8  ;;  %4865 = vmatprep.subr.bf16.mxu0 %v4864_v27  ;;  %v4872_v8 = vpack.c.bf16 %v3528_v30, %v3527_v11  ;;  %v4932_v47 = vpack.c.bf16 %v3564_v29, %v3563_v32  ;;  %v3567_v30 = vld [vmem:[%s6710_s4 + $0x240] sm:$0xff]  ;;  %v6523_v32 = vld [vmem:[%s6713_s7 + $0xf0] sm:$0xff]  ;;  %v6528_v29 = vld [vmem:[%s6713_s7 + $0xf8] sm:$0xff] }
 0x18e   :  { %4893 = vmatprep.subr.bf16.mxu1 %v4892_v57 }
 0x18f   :  { %4867 = vmatpush3.bf16.msra.mxu0 %v4864_v27  ;;  %v3581_v27 = vld [vmem:[%s6711_s5 + $0x228] sm:$0xff] }
 0x190   :  { %4895 = vmatpush3.bf16.msra.mxu1 %v4892_v57  ;;  %4869 = vmatprep.subr.bf16.mxu0 %v4868_v17  ;;  %v4960_v42 = vpack.c.bf16 %v3581_v27, %v3580_v63  ;;  %v3565_v57 = vld [vmem:[%s6710_s4 + $0x230] sm:$0xff] }
 0x191   :  { %4897 = vmatprep.subr.bf16.mxu1 %v4896_v24 }
 0x193   :  { %4871 = vmatpush3.bf16.msra.mxu0 %v4868_v17  ;;  %v3583_v17 = vld [vmem:[%s6711_s5 + $0x238] sm:$0xff] }
 0x194   :  { %4899 = vmatpush3.bf16.msra.mxu1 %v4896_v24  ;;  %4873 = vmatprep.subr.bf16.mxu0 %v4872_v8  ;;  %v4936_v24 = vpack.c.bf16 %v3566_v34, %v3565_v57  ;;  %v4964_v11 = vpack.c.bf16 %v3583_v17, %v3582_v4 }
 0x195   :  { %4901 = vmatprep.subr.bf16.mxu1 %v4900_v36 }
 0x197   :  { %4875 = vmatpush3.bf16.msra.mxu0 %v4872_v8  ;;  %v3585_v8 = vld [vmem:[%s6711_s5 + $0x248] sm:$0xff] }
 0x198   :  { %4903 = vmatpush3.bf16.msra.mxu1 %v4900_v36  ;;  %4877 = vmatprep.subr.bf16.mxu0 %v4876_v44  ;;  %v4940_v36 = vpack.c.bf16 %v3568_v39, %v3567_v30  ;;  %v4968_v7 = vpack.c.bf16 %v3585_v8, %v3584_v35 }
 0x199   :  { %4905 = vmatprep.subr.bf16.mxu1 %v4904_v62 }
 0x19b   :  { %4879 = vmatpush3.bf16.msra.mxu0 %v4876_v44  ;;  %v2813_v44 = vld [vmem:[%s6713_s7 + $0x8] sm:$0xff] }
 0x19c   :  { %4907 = vmatpush3.bf16.msra.mxu1 %v4904_v62  ;;  %4881 = vmatprep.subr.bf16.mxu0 %v4880_v46  ;;  %v3598_v62 = vld [vmem:[%s6713_s7 + $0x50] sm:$0xff]  ;;  %v4988_v28 = vpack.c.bf16 %v2813_v44, %v2812_v54 }
 0x19d   :  { %4909 = vmatprep.subr.bf16.mxu1 %v4908_v51  ;;  %v4973_v49 = vpack.c.bf16 %v3599_v41, %v3598_v62 }
 0x19f   :  { %4883 = vmatpush3.bf16.msra.mxu0 %v4880_v46  ;;  %v2814_v46 = vld [vmem:[%s6713_s7 + $0x10] sm:$0xff] }
 0x1a0   :  { %4911 = vmatpush3.bf16.msra.mxu1 %v4908_v51  ;;  %4885 = vmatprep.subr.bf16.mxu0 %v4884_v45  ;;  %v2815_v51 = vld [vmem:[%s6713_s7 + $0x18] sm:$0xff] }
 0x1a1   :  { %4913 = vmatprep.subr.bf16.mxu1 %v4912_v55  ;;  %v4991_v60 = vpack.c.bf16 %v2815_v51, %v2814_v46 }
 0x1a3   :  { %4887 = vmatpush3.bf16.msra.mxu0 %v4884_v45  ;;  %v5179_v45 = vmov 0.0  }
 0x1a4   :  { %4915 = vmatpush3.bf16.msra.mxu1 %v4912_v55  ;;  %4361 = vmatprep.subr.mxu0 %v3535_v0 }
 0x1a5   :  { %4394 = vmatprep.subr.mxu1 %v3552_v58 }
 0x1a7   :  { %4362 = vmatpush3.msra.mxu0 %v3535_v0  ;;  %v3602_v0 = vld [vmem:[%s6713_s7 + $0x70] sm:$0xff] }
 0x1a8   :  { %4395 = vmatpush3.msra.mxu1 %v3552_v58  ;;  %4364 = vmatmul.mubr.msk.f32.vlgmr.msra.gmra.mrb[6].mxu0 %vm1692_vm11, %v6089_v61  ;;  %v3603_v58 = vld [vmem:[%s6713_s7 + $0x78] sm:$0xff] }
 0x1a9   :  { %4397 = vmatmul.mubr.msk.f32.vlgmr.msra.gmra.mrb[12].mxu1 %vm1692_vm11, %v6089_v61  ;;  %4917 = vmatprep.subr.bf16.mxu0 %v4916_v26  ;;  %v4952_v61 = vpack.c.bf16 %v3577_v13, %v3576_v12  ;;  %v4979_v2 = vpack.c.bf16 %v3603_v58, %v3602_v0  ;;  %v3597_v12 = vld [vmem:[%s6712_s6] ss:$0 sm:$0xff] }
 0x1aa   :  { %4945 = vmatprep.subr.bf16.mxu1 %v4944_v15  ;;  %4919 = vmatpush3.bf16.msra.mxu0 %v4916_v26  ;;  %v3604_v26 = vld [vmem:[%s6713_s7 + $0x80] sm:$0xff]  ;;  %v2767_v13 = vcombine.high %v3597_v12, %v3597_v12 }
 0x1ab   :  { %4429 = vmatprep.mubr.msk.f32.mxu0 %vm1692_vm11, %v6104_v22  ;;  %4947 = vmatpush3.bf16.msra.mxu1 %v4944_v15  ;;  %v4982_v15 = vpack.c.bf16 %v3605_v6, %v3604_v26 }
 0x1ac   :  { %4462 = vmatprep.mubr.msk.f32.mxu1 %vm1692_vm11, %v6104_v22  ;;  %4921 = vmatprep.subr.bf16.mxu0 %v4920_v33  ;;  %v4928_v22 = vpack.c.bf16 %v3562_v21, %v3561_v18 }
 0x1ad   :  { %4949 = vmatprep.subr.bf16.mxu1 %v4948_v5 }
 0x1ae   :  { %4923 = vmatpush3.bf16.msra.mxu0 %v4920_v33  ;;  %v3606_v33 = vld [vmem:[%s6713_s7 + $0x90] sm:$0xff] }
 0x1af   :  { %4951 = vmatpush3.bf16.msra.mxu1 %v4948_v5  ;;  %4925 = vmatprep.subr.bf16.mxu0 %v4924_v43  ;;  %v4985_v5 = vpack.c.bf16 %v3607_v16, %v3606_v33 }
 0x1b0   :  { %4953 = vmatprep.subr.bf16.mxu1 %v4952_v61 }
 0x1b2   :  { %4927 = vmatpush3.bf16.msra.mxu0 %v4924_v43  ;;  %v2781_v43 = vrot.slane %v2767_v13, %v5732_v38  ;;  %v3623_v13 = vld [vmem:[%s6713_s7 + $0x100] sm:$0xff] }
 0x1b3   :  { %4955 = vmatpush3.bf16.msra.mxu1 %v4952_v61  ;;  %4929 = vmatprep.subr.bf16.mxu0 %v4928_v22  ;;  %v2774_v61 = vrot.slane %v3597_v12, %v5732_v38 }
 0x1b4   :  { %4957 = vmatprep.subr.bf16.mxu1 %v4956_v31  ;;  %v2786_v34 = vrot.slane %v2781_v43, 1 }
 0x1b5   :  { %v2782_v27 = vcombine.high %v2774_v61, %v2774_v61  ;;  %v2784_v57 = vrot.slane %v2774_v61, 1 }
 0x1b6   :  { %4931 = vmatpush3.bf16.msra.mxu0 %v4928_v22  ;;  %v2783_v22 = vcombine.high %v2781_v43, %v2781_v43 }
 0x1b7   :  { %4959 = vmatpush3.bf16.msra.mxu1 %v4956_v31  ;;  %4933 = vmatprep.subr.bf16.mxu0 %v4932_v47 }
 0x1b8   :  { %4961 = vmatprep.subr.bf16.mxu1 %v4960_v42  ;;  %v2787_v35 = vrot.slane %v2783_v22, 1 }
 0x1ba   :  { %4935 = vmatpush3.bf16.msra.mxu0 %v4932_v47 }
 0x1bb   :  { %4963 = vmatpush3.bf16.msra.mxu1 %v4960_v42  ;;  %4937 = vmatprep.subr.bf16.mxu0 %v4936_v24 }
 0x1bc   :  { %4965 = vmatprep.subr.bf16.mxu1 %v4964_v11 }
 0x1be   :  { %4939 = vmatpush3.bf16.msra.mxu0 %v4936_v24  ;;  %v5018_v24 = vpack.c.bf16 %v6528_v29, %v6523_v32 }
 0x1bf   :  { %4967 = vmatpush3.bf16.msra.mxu1 %v4964_v11  ;;  %4941 = vmatprep.subr.bf16.mxu0 %v4940_v36 }
 0x1c0   :  { %4969 = vmatprep.subr.bf16.mxu1 %v4968_v7 }
 0x1c2   :  { %4943 = vmatpush3.bf16.msra.mxu0 %v4940_v36 }
 0x1c3   :  { %4971 = vmatpush3.bf16.msra.mxu1 %v4968_v7  ;;  %4427 = vmatprep.subr.mxu0 %v3569_v37 }
 0x1c4   :  { %4460 = vmatprep.subr.mxu1 %v3586_v48 }
 0x1c6   :  { %4428 = vmatpush3.msra.mxu0 %v3569_v37  ;;  %v2785_v37 = vrot.slane %v2782_v27, 1 }
 0x1c7   :  { %4461 = vmatpush3.msra.mxu1 %v3586_v48  ;;  %4430 = vmatmul.mubr.msk.f32.vlgmr.msra.gmra.mrb[6].mxu0 %vm1692_vm11, %v6133_v25 }
 0x1c8   :  { %4463 = vmatmul.mubr.msk.f32.vlgmr.msra.gmra.mrb[12].mxu1 %vm1692_vm11, %v6133_v25  ;;  %4987 = vmatprep.subr.bf16.mxu1 %v5177_v53  ;;  %v3600_v25 = vld [vmem:[%s6713_s7 + $0x60] sm:$0xff] }
 0x1c9   :  { %4989 = vmatpush3.bf16.msra.mxu1 %v4988_v28  ;;  %4972 = vmatprep.subr.bf16.mxu0 %v5177_v53  ;;  %v4976_v55 = vpack.c.bf16 %v3601_v10, %v3600_v25 }
 0x1ca   :  { %4974 = vmatpush3.bf16.msra.mxu0 %v4973_v49  ;;  %4990 = vmatprep.subr.bf16.mxu1 %v5177_v53 }
 0x1cb   :  { %4975 = vmatprep.subr.bf16.mxu0 %v5177_v53  ;;  %4508 = vmatprep.mubr.msk.f32.mxu1 %vm5178_vm12, %v5179_v45 }
 0x1cc   :  { %4485 = vmatprep.mubr.msk.f32.mxu0 %vm5178_vm12, %v5179_v45 }
 0x1cd   :  { %4992 = vmatpush3.bf16.msra.mxu1 %v4991_v60 }
 0x1ce   :  { %4977 = vmatpush3.bf16.msra.mxu0 %v4976_v55  ;;  %4993 = vmatprep.subr.bf16.mxu1 %v5177_v53 }
 0x1cf   :  { %4978 = vmatprep.subr.bf16.mxu0 %v5177_v53 }
 0x1d1   :  { %4995 = vmatpush3.bf16.msra.mxu1 %v4994_v3 }
 0x1d2   :  { %4980 = vmatpush3.bf16.msra.mxu0 %v4979_v2  ;;  %4996 = vmatprep.subr.bf16.mxu1 %v5177_v53 }
 0x1d3   :  { %4981 = vmatprep.subr.bf16.mxu0 %v5177_v53 }
 0x1d5   :  { %4998 = vmatpush3.bf16.msra.mxu1 %v4997_v14  ;;  %v3610_v14 = vld [vmem:[%s6713_s7 + $0xa0] sm:$0xff] }
 0x1d6   :  { %4983 = vmatpush3.bf16.msra.mxu0 %v4982_v15  ;;  %4999 = vmatprep.subr.bf16.mxu1 %v5177_v53  ;;  %v3611_v15 = vld [vmem:[%s6713_s7 + $0xa8] sm:$0xff] }
 0x1d7   :  { %4984 = vmatprep.subr.bf16.mxu0 %v5177_v53 }
 0x1d9   :  { %5001 = vmatpush3.bf16.msra.mxu1 %v5000_v20 }
 0x1da   :  { %4986 = vmatpush3.bf16.msra.mxu0 %v4985_v5  ;;  %5017 = vmatprep.subr.bf16.mxu1 %v5177_v53 }
 0x1db   :  { %5002 = vmatprep.subr.bf16.mxu0 %v5177_v53 }
 0x29a   :  { %v4431_v18 = vpop.f32.mrb[6].mxu0 }
 0x29b   :  { %v4464_v21 = vpop.f32.mrb[12].mxu1  ;;  %v2579_v19 = vpop.f32.mrb[7].mxu0 }
 0x29c   :  { %v2684_v50 = vmax.f32 %v4431_v18, %v4464_v21  ;;  %v2670_v31 = vpop.f32.mrb[13].mxu1  ;;  %v5003_v21 = vpack.c.bf16 %v3611_v15, %v3610_v14  ;;  %v3210_v14 = vld [vmem:[%s6715_s9 + $0x58] sm:$0xff] }
 0x29d   :  { %v2683_v63 = vmax.f32 %v2579_v19, %v2670_v31 }
 0x29e   :  { %v2704_v47 = vcombine.high %v2684_v50, %v2684_v50  ;;  %v2711_v42 = vrot.slane %v2684_v50, %v5732_v38 }
 0x29f   :  { %v2687_v4 = vcombine.high %v2683_v63, %v2683_v63  ;;  %v2694_v17 = vrot.slane %v2683_v63, %v5732_v38 }
 0x2a0   :  { %v2718_v11 = vrot.slane %v2704_v47, %v5732_v38  ;;  %v2719_v30 = vcombine.high %v2711_v42, %v2711_v42  ;;  %v3593_v39 = vrot.slane %v2711_v42, 9  ;;  %v3613_v47 = vld [vmem:[%s6713_s7 + $0xb8] sm:$0xff] }
 0x2a1   :  { %v2701_v8 = vrot.slane %v2687_v4, %v5732_v38  ;;  %v2702_v36 = vcombine.high %v2694_v17, %v2694_v17  ;;  %v3589_v7 = vrot.slane %v2694_v17, 9 }
 0x2a2   :  { %v2720_v48 = vcombine.high %v2718_v11, %v2718_v11  ;;  %v3594_v54 = vrot.slane %v2719_v30, 9  ;;  %v3595_v44 = vrot.slane %v2718_v11, 9  ;;  %v2757_v62 = vmax.f32 %v2711_v42, %v3593_v39  ;;  %v3615_v39 = vld [vmem:[%s6713_s7 + $0xc8] sm:$0xff] }
 0x2a3   :  { %v2703_v41 = vcombine.high %v2701_v8, %v2701_v8  ;;  %v3590_v28 = vrot.slane %v2702_v36, 9  ;;  %v3591_v49 = vrot.slane %v2701_v8, 9  ;;  %v2753_v46 = vmax.f32 %v2694_v17, %v3589_v7  ;;  %v3625_v17 = vld [vmem:[%s6713_s7 + $0x110] sm:$0xff] }
 0x2a4   :  { %v3596_v51 = vrot.slane %v2720_v48, 9  ;;  %v2758_v25 = vmax.f32 %v2719_v30, %v3594_v54  ;;  %v2759_v60 = vmax.f32 %v2718_v11, %v3595_v44  ;;  %v2800_v10 = vadd.f32 %v2781_v43, %v2757_v62  ;;  %v3624_v43 = vld [vmem:[%s6713_s7 + $0x108] sm:$0xff]  ;;  %v3629_v44 = vld [vmem:[%s6713_s7 + $0x130] sm:$0xff]  ;;  %v3630_v62 = vld [vmem:[%s6713_s7 + $0x138] sm:$0xff] }
 0x2a5   :  { %v3592_v1 = vrot.slane %v2703_v41, 9  ;;  %v2754_v59 = vmax.f32 %v2702_v36, %v3590_v28  ;;  %v2755_v55 = vmax.f32 %v2701_v8, %v3591_v49  ;;  %v2796_v38 = vadd.f32 %v2774_v61, %v2753_v46  ;;  %v3627_v8 = vld [vmem:[%s6713_s7 + $0x120] sm:$0xff]  ;;  %v3628_v36 = vld [vmem:[%s6713_s7 + $0x128] sm:$0xff] }
 0x2a6   :  { %v2760_v0 = vmax.f32 %v2720_v48, %v3596_v51  ;;  %v2801_v58 = vadd.f32 %v2786_v34, %v2758_v25  ;;  %v2802_v3 = vadd.f32 %v2783_v22, %v2759_v60  ;;  %v2808_v2 = vmax.f32 %v2800_v10, 0.0  ;;  %v3617_v48 = vld [vmem:[%s6713_s7 + $0xd8] sm:$0xff]  ;;  %v3618_v28 = vld [vmem:[%s6713_s7 + $0xe0] sm:$0xff]  ;;  %v3619_v49 = vld [vmem:[%s6713_s7 + $0xe8] sm:$0xff] }
 0x2a7   :  { %v2756_v56 = vmax.f32 %v2703_v41, %v3592_v1  ;;  %v2797_v23 = vadd.f32 %v2784_v57, %v2754_v59  ;;  %v2798_v26 = vadd.f32 %v2782_v27, %v2755_v55  ;;  %v2804_v6 = vmax.f32 %v2796_v38, 0.0  ;;  %v3612_v27 = vld [vmem:[%s6713_s7 + $0xb0] sm:$0xff]  ;;  %v3199_v25 = vld [vmem:[%s6715_s9] sm:$0xff]  ;;  %v3200_v60 = vld [vmem:[%s6715_s9 + $0x8] sm:$0xff] }
 0x2a8   :  { %v2809_v9 = vmax.f32 %v2801_v58, 0.0  ;;  %v2810_v40 = vmax.f32 %v2802_v3, 0.0  ;;  %v2926_v33 = vrot.slane %v2808_v2, %v5758_v52  ;;  %v2803_v16 = vadd.f32 %v2787_v35, %v2760_v0  ;;  %v3201_v1 = vld [vmem:[%s6715_s9 + $0x10] sm:$0xff]  ;;  %v3202_v59 = vld [vmem:[%s6715_s9 + $0x18] sm:$0xff]  ;;  %v3203_v55 = vld [vmem:[%s6715_s9 + $0x20] sm:$0xff] }
 0x2a9   :  { %v2805_v20 = vmax.f32 %v2797_v23, 0.0  ;;  %v2806_v5 = vmax.f32 %v2798_v26, 0.0  ;;  %v2922_v12 = vrot.slane %v2804_v6, %v5758_v52  ;;  %v2799_v61 = vadd.f32 %v2785_v37, %v2756_v56  ;;  %v3616_v37 = vld [vmem:[%s6713_s7 + $0xd0] sm:$0xff]  ;;  %v3204_v0 = vld [vmem:[%s6715_s9 + $0x28] sm:$0xff]  ;;  %v3206_v3 = vld [vmem:[%s6715_s9 + $0x38] sm:$0xff] }
 0x2aa   :  { %v2842_v18 = vrot.slane %v2809_v9, %v5758_v52  ;;  %v2811_v19 = vmax.f32 %v2803_v16, 0.0  ;;  %v3020_v50 = vrot.slane %v2810_v40, %v5758_v52  ;;  %v5021_v63 = vpack.c.bf16 %v3624_v43, %v3623_v13  ;;  %v3205_v58 = vld [vmem:[%s6715_s9 + $0x30] sm:$0xff]  ;;  %v3207_v56 = vld [vmem:[%s6715_s9 + $0x40] sm:$0xff]  ;;  %v3208_v23 = vld [vmem:[%s6715_s9 + $0x48] sm:$0xff] }
 0x2ab   :  { %v2927_v22 = vsel %vm1671_vm4, %v2926_v33, %v2922_v12  ;;  %v2838_v31 = vrot.slane %v2805_v20, %v5758_v52  ;;  %v2807_v32 = vmax.f32 %v2799_v61, 0.0  ;;  %v3016_v29 = vrot.slane %v2806_v5, %v5758_v52  ;;  %v3209_v6 = vld [vmem:[%s6715_s9 + $0x50] sm:$0xff]  ;;  %v3211_v9 = vld [vmem:[%s6715_s9 + $0x60] sm:$0xff]  ;;  %v3212_v40 = vld [vmem:[%s6715_s9 + $0x68] sm:$0xff] }
 0x2ac   :  { %4509 = vmatmul.mubr.msk.f32.vlgmr.msra.gmra.mrb[14].mxu1 %vm2844_vm13, %v2927_v22  ;;  %v3115_v42 = vrot.slane %v2811_v19, %v5758_v52  ;;  %v5006_v11 = vpack.c.bf16 %v3613_v47, %v3612_v27  ;;  %v5027_v54 = vpack.c.bf16 %v3628_v36, %v3627_v8  ;;  %v5012_v41 = vpack.c.bf16 %v3617_v48, %v3616_v37  ;;  %v3213_v33 = vld [vmem:[%s6715_s9 + $0x70] sm:$0xff]  ;;  %v3214_v20 = vld [vmem:[%s6715_s9 + $0x78] sm:$0xff]  ;;  %s5180_s9 = smov [#allocation2]  }
 0x2ad   :  { %5019 = vmatpush3.bf16.msra.mxu1 %v5018_v24  ;;  %v2843_v57 = vsel %vm1671_vm4, %v2842_v18, %v2838_v31  ;;  %4554 = vmatprep.mubr.msk.f32.mxu1 %vm5178_vm12, %v5179_v45  ;;  %v3111_v34 = vrot.slane %v2807_v32, %v5758_v52  ;;  %v3021_v4 = vsel %vm1671_vm4, %v3020_v50, %v3016_v29  ;;  %v3626_v24 = vld [vmem:[%s6713_s7 + $0x118] sm:$0xff]  ;;  %v3614_v52 = vld [vmem:[%s6713_s7 + $0xc0] sm:$0xff]  ;;  %s3300_s21 = sshll.u32 %s5180_s9, 4  ;;  %s3301_s21 = int_to_ptr.vmem [resolvable:$true] %s3300_s21 }
 0x2ae   :  { %4486 = vmatmul.mubr.msk.f32.vlgmr.msra.gmra.mrb[8].mxu0 %vm2844_vm13, %v2843_v57  ;;  %5020 = vmatprep.subr.bf16.mxu1 %v5177_v53  ;;  %v5024_v35 = vpack.c.bf16 %v3626_v24, %v3625_v17  ;;  %v5009_v7 = vpack.c.bf16 %v3615_v39, %v3614_v52  ;;  %v5030_v46 = vpack.c.bf16 %v3630_v62, %v3629_v44  ;;  %v3632_v32 = vld [vmem:[%s6714_s8] ss:$0 sm:$0xff]  ;;  %s5127_s22 = scalar_lea.vmem %s3301_s21, 32  ;;  %p5132_p1 = scmp.lt.s32.totalorder %s3301_s21, %s3301_s21 }
 0x2af   :  { %5004 = vmatpush3.bf16.msra.mxu0 %v5003_v21  ;;  %v3116_v30 = vsel %vm1671_vm4, %v3115_v42, %v3111_v34  ;;  %4531 = vmatprep.mubr.msk.f32.mxu0 %vm5178_vm12, %v5179_v45  ;;  %v5015_v51 = vpack.c.bf16 %v3619_v49, %v3618_v28  ;;  %v5033_v10 = vpack.c.bf16 %v3200_v60, %v3199_v25  ;;  %p5128_p0 = scmp.ne.s32.totalorder %s3301_s21, %s5127_s22  ;;  %p5133_p2 = scmp.lt.s32.totalorder %s5127_s22, %s5127_s22 }
 0x2b0   :  { %5005 = vmatprep.subr.bf16.mxu0 %v5177_v53  ;;  %v5036_v38 = vpack.c.bf16 %v3202_v59, %v3201_v1  ;;  %v5042_v2 = vpack.c.bf16 %v3206_v3, %v3205_v58  ;;  %v5045_v26 = vpack.c.bf16 %v3208_v23, %v3207_v56  ;;  %v5048_v15 = vpack.c.bf16 %v3210_v14, %v3209_v6 }
 0x2b1   :  { %5022 = vmatpush3.bf16.msra.mxu1 %v5021_v63  ;;  %v5051_v16 = vpack.c.bf16 %v3212_v40, %v3211_v9  ;;  %v5054_v5 = vpack.c.bf16 %v3214_v20, %v3213_v33  ;;  %p5134_p3 = por %p5133_p2, %p5132_p1 }
 0x2b2   :  { %5023 = vmatprep.subr.bf16.mxu1 %v5177_v53 }
 0x2b3   :  { %5007 = vmatpush3.bf16.msra.mxu0 %v5006_v11  ;;  %p5135_p4 = pnand %p5134_p3, %p5128_p0 }
 0x2b4   :  { %5008 = vmatprep.subr.bf16.mxu0 %v5177_v53 }
 0x2b5   :  { %5025 = vmatpush3.bf16.msra.mxu1 %v5024_v35 }
 0x2b6   :  { %5026 = vmatprep.subr.bf16.mxu1 %v5177_v53 }
 0x2b7   :  { %5010 = vmatpush3.bf16.msra.mxu0 %v5009_v7 }
 0x2b8   :  { %5011 = vmatprep.subr.bf16.mxu0 %v5177_v53 }
 0x2b9   :  { %5028 = vmatpush3.bf16.msra.mxu1 %v5027_v54 }
 0x2ba   :  { %5029 = vmatprep.subr.bf16.mxu1 %v5177_v53 }
 0x2bb   :  { %5013 = vmatpush3.bf16.msra.mxu0 %v5012_v41 }
 0x2bc   :  { %5014 = vmatprep.subr.bf16.mxu0 %v5177_v53 }
 0x2bd   :  { %5031 = vmatpush3.bf16.msra.mxu1 %v5030_v46 }
 0x2bf   :  { %5016 = vmatpush3.bf16.msra.mxu0 %v5015_v51 }
 0x2c0   :  { %4555 = vmatmul.mubr.msk.f32.vlgmr.msra.gmra.mrb[16].mxu1 %vm2844_vm13, %v3116_v30  ;;  %5032 = vmatprep.subr.bf16.mxu0 %v5177_v53 }
 0x2c2   :  { %4532 = vmatmul.mubr.msk.f32.vlgmr.msra.gmra.mrb[10].mxu0 %vm2844_vm13, %v3021_v4 }
 0x2c3   :  { %5034 = vmatpush3.bf16.msra.mxu0 %v5033_v10  ;;  %4589 = vmatprep.mubr.msk.f32.mxu0 %vm5178_vm12, %v5179_v45  ;;  %v5039_v45 = vpack.c.bf16 %v3204_v0, %v3203_v55 }
 0x2c4   :  { %5035 = vmatprep.subr.bf16.mxu0 %v5177_v53 }
 0x2c7   :  { %5037 = vmatpush3.bf16.msra.mxu0 %v5036_v38 }
 0x2c8   :  { %5038 = vmatprep.subr.bf16.mxu0 %v5177_v53 }
 0x2cb   :  { %5040 = vmatpush3.bf16.msra.mxu0 %v5039_v45 }
 0x2cc   :  { %5041 = vmatprep.subr.bf16.mxu0 %v5177_v53 }
 0x2cf   :  { %5043 = vmatpush3.bf16.msra.mxu0 %v5042_v2 }
 0x2d0   :  { %5044 = vmatprep.subr.bf16.mxu0 %v5177_v53 }
 0x2d3   :  { %5046 = vmatpush3.bf16.msra.mxu0 %v5045_v26 }
 0x2d4   :  { %5047 = vmatprep.subr.bf16.mxu0 %v5177_v53 }
 0x2d7   :  { %5049 = vmatpush3.bf16.msra.mxu0 %v5048_v15 }
 0x2d8   :  { %5050 = vmatprep.subr.bf16.mxu0 %v5177_v53 }
 0x2db   :  { %5052 = vmatpush3.bf16.msra.mxu0 %v5051_v16 }
 0x2dc   :  { %5053 = vmatprep.subr.bf16.mxu0 %v5177_v53 }
 0x2df   :  { %5055 = vmatpush3.bf16.msra.mxu0 %v5054_v5 }
 0x37f   :  { %v2996_v12 = vpop.f32.mrb[14].mxu1 }
 0x380   :  { %v4510_v13 = vpop.f32.mrb[15].mxu1 }
 0x381   :  { %v2913_v43 = vpop.f32.mrb[8].mxu0 }
 0x382   :  { %v2997_v61 = vadd.f32 %v2996_v12, %v2913_v43  ;;  %v4487_v18 = vpop.f32.mrb[9].mxu0 }
 0x393   :  { %v3185_v21 = vpop.f32.mrb[16].mxu1 }
 0x394   :  { %v4556_v19 = vpop.f32.mrb[17].mxu1 }
 0x395   :  { %v3090_v50 = vpop.f32.mrb[10].mxu0 }
 0x396   :  { %v3094_v22 = vadd.f32 %v3090_v50, %v2997_v61  ;;  %v4533_v31 = vpop.f32.mrb[11].mxu0 }
 0x398   :  { %v3189_v29 = vadd.f32 %v3185_v21, %v3094_v22 }
 0x39a   :  { %v3197_v63 = vadd.f32 %v3632_v32, %v3189_v29 }
 0x39c   :  { %v3198_v27 = vmax.f32 %v3197_v63, 0.0 }
 0x39e   :  { %3292 = vst [vmem:[#allocation2] sm:$0x3] %v3198_v27  ;;  %4590 = vmatmul.mubr.f32.vlgmr.msra.gmra.mrb[12].mxu0 %v3198_v27 }
 0x39f   :  { %5138 = shalt.err (!%p5135_p4)
}
 0x3a0   :  { %s5139_s25 = scalar_lea.hbm %s6717_s11, 32 }
 0x3a1   :  { %p5140_p5 = scmp.ne.s32.totalorder %s6717_s11, %s5139_s25  ;;  %p5143_p6 = scmp.lt.u32.totalorder %s5139_s25, %s6717_s11 }
 0x3a3   :  { %p5145_p7 = pnand %p5143_p6, %p5140_p5 }
 0x3a5   :  { %5148 = shalt.err (!%p5145_p7)
}
 0x3a6   :  { %3303 = dma.vmem_to_hbm [thread:$0]  %s3301_s21, 32, %s6717_s11, [#allocation3]   ;;  %v3633_v53 = vld [vmem:[%s6716_s10] ss:$0 sm:$0xff] }
 0x3a7   :  { %s5181_s14 = smov [#allocation4]  }
 0x3a8   :  { %s3310_s0 = sshll.u32 %s5181_s14, 4  ;;  %s3311_s0 = int_to_ptr.vmem [resolvable:$true] %s3310_s0 }
 0x3a9   :  { %s5149_s2 = scalar_lea.vmem %s3311_s0, 32  ;;  %p5154_p9 = scmp.lt.s32.totalorder %s3311_s0, %s3311_s0 }
 0x3aa   :  { %p5150_p8 = scmp.ne.s32.totalorder %s3311_s0, %s5149_s2  ;;  %p5155_p10 = scmp.lt.s32.totalorder %s5149_s2, %s5149_s2 }
 0x3ac   :  { %p5156_p11 = por %p5155_p10, %p5154_p9 }
 0x3ae   :  { %p5157_p12 = pnand %p5156_p11, %p5150_p8 }
 0x471   :  { %v3288_v47 = vpop.f32.mrb[12].mxu0 }
 0x472   :  { %v3289_v42 = vadd.f32 %v3633_v53, %v3288_v47  ;;  %v4591_v57 = vpop.f32.mrb[13].mxu0 }
 0x474   :  { %3293 = vst [vmem:[#allocation4] sm:$0x3] %v3289_v42 }
 0x475   :  { %5160 = shalt.err (!%p5157_p12)
}
 0x476   :  { %s5161_s4 = scalar_lea.hbm %s6718_s12, 32 }
 0x477   :  { %p5162_p13 = scmp.ne.s32.totalorder %s6718_s12, %s5161_s4  ;;  %p5165_p0 = scmp.lt.u32.totalorder %s5161_s4, %s6718_s12 }
 0x479   :  { %p5167_p1 = pnand %p5165_p0, %p5162_p13 }
 0x47b   :  { %5170 = shalt.err (!%p5167_p1)
}
 0x47c   :  { %3313 = dma.vmem_to_hbm [thread:$0]  %s3311_s0, 32, %s6718_s12, [#allocation5]  }
 0x47d   :  { %5171 = dma.done.wait [#allocation3], 32  }
 0x47e   :  { %5172 = vsyncadd [#allocation3], 4294967264 }
 0x47f   :  { %5173 = dma.done.wait [#allocation5], 32  }
 0x480   :  { %5174 = vsyncadd [#allocation5], 4294967264 }
 0x481   :  { %3320 = vsyncpa [#allocation3], 1 }
 0x482   :  { %3321 = vsyncpa [#allocation5], 1 }

</bundles_post_ra>
